<compile_context>
chip_gen: v7x
topology: tpu7x:2x2x1
jax: 0.10.0
libtpu: 0.0.40
codegen_flags: <defaults>
</compile_context>

<pallas_src>
import jax
import jax.numpy as jnp
from jax import lax
from jax.experimental import pallas as pl
from jax.experimental.pallas import tpu as pltpu


LANE = 128


def _round_up(v, m):
    return (v + m - 1) // m * m


def _im2col(x, k):
    """x: (N, C, H, W) -> (N, OH*OW, C*k*k), feature order (c, kh, kw)."""
    N, C, H, W = x.shape
    OH, OW = H - k + 1, W - k + 1
    cols = []
    for i in range(k):
        for j in range(k):
            cols.append(x[:, :, i:i + OH, j:j + OW])   # (N, C, OH, OW)
    p = jnp.stack(cols, axis=-1)                       # (N, C, OH, OW, k*k)
    p = p.transpose(0, 2, 3, 1, 4)                     # (N, OH, OW, C, k*k)
    return p.reshape(N, OH * OW, C * k * k)


def _pad2d(a, rows, cols):
    return jnp.pad(a, ((0, rows - a.shape[0]), (0, cols - a.shape[1])))


def _vmem_capacity_bytes():
    try:
        return int(pltpu.get_tpu_info().vmem_capacity_bytes)
    except Exception:          # interpret mode / old runtime: assume 128 MiB part
        return 128 * 1024 * 1024


def _default_p_tile(B, itemsize, vmem_bytes):
    # Budget ~40% of VMEM for the per-step working set: the double-buffered
    # patch block with its true lane-padded footprint (CKK=147 stores as 256
    # lanes) plus the f32 (B*TP, 128) conv-feature intermediate.
    budget = int(vmem_bytes * 0.40)
    per_tp = B * (2 * 256 * itemsize + 128 * 4)
    tp = budget // per_tp
    cap = 8192 if vmem_bytes >= (100 << 20) else 4096   # 128 MiB parts vs v7x (64 MiB)
    return int(max(256, min(cap, (tp // 256) * 256)))


def cnniqa_forward(x, params, *, batch_block=4, p_tile=None,
                   compute_dtype=jnp.bfloat16):
    wconv, bconv, w1, b1, w2, b2, w3, b3 = params
    N, C, H, W = x.shape
    n_kers, _, k, _ = wconv.shape
    OH, OW = H - k + 1, W - k + 1
    P = OH * OW
    CKK = C * k * k
    n1 = w1.shape[0]
    n2 = w2.shape[0]

    nk_p = _round_up(n_kers, LANE)
    n1_p = _round_up(n1, LANE)
    n2_p = _round_up(n2, LANE)
    no_p = LANE                    # lane-dense output slab; column 0 holds the score

    # ---- batch blocking: keep >=2 'parallel' steps so both v7x TCs get work ---
    B = max(1, min(batch_block, N))
    if N >= 2 and pl.cdiv(N, B) < 2:
        B = pl.cdiv(N, 2)
    # TODO(synk): for N == 1 on v7x (2 TensorCores) make the P axis the parallel
    # dimension (per-core partial max/min combined in a tiny epilogue).
    N_pad = _round_up(N, B)

    # ---- P (output-pixel) tiling, sized from the chip's VMEM ------------------
    itemsize = jnp.dtype(compute_dtype).itemsize
    vmem_bytes = _vmem_capacity_bytes()
    if p_tile is None:
        p_tile = _default_p_tile(B, itemsize, vmem_bytes)
    TP = int(min(_round_up(max(8, p_tile), 8), _round_up(P, 8)))
    P_pad = _round_up(P, TP)

    # ---- inputs: im2col (directly in compute dtype) + edge padding ------------
    patches = _im2col(x.astype(compute_dtype), k)                   # (N, P, CKK)
    # Edge replication of padded batch / pixel rows: duplicates of valid rows
    # can never change a global max/min, so no validity mask is needed in-kernel.
    patches = jnp.pad(patches, ((0, N_pad - N), (0, P_pad - P), (0, 0)),
                      mode='edge')

    wconv_m = _pad2d(wconv.reshape(n_kers, CKK).T, CKK, nk_p).astype(compute_dtype)
    bconv_m = _pad2d(bconv.reshape(1, n_kers).astype(jnp.float32), 1, nk_p)
    # torch Linear weight is (out, in); fc1's input is [maxpool | minpool].
    w1a = _pad2d(w1[:, :n_kers].T, nk_p, n1_p).astype(compute_dtype)
    w1b = _pad2d(w1[:, n_kers:].T, nk_p, n1_p).astype(compute_dtype)
    b1_m = _pad2d(b1.reshape(1, n1).astype(jnp.float32), 1, n1_p)
    w2_m = _pad2d(w2.T, n1_p, n2_p).astype(compute_dtype)
    b2_m = _pad2d(b2.reshape(1, n2).astype(jnp.float32), 1, n2_p)
    w3_m = _pad2d(w3.T, n2_p, no_p).astype(compute_dtype)
    b3_m = _pad2d(b3.reshape(1, 1).astype(jnp.float32), 1, no_p)

    grid = (N_pad // B, P_pad // TP)

    def kernel(patch_ref, wc_ref, bc_ref, w1a_ref, w1b_ref, b1_ref,
               w2_ref, b2_ref, w3_ref, b3_ref, out_ref, mx_s, mn_s):
        p = pl.program_id(1)
        n_p = pl.num_programs(1)

        @pl.when(p == 0)
        def _init():
            mx_s[...] = jnp.full(mx_s.shape, -jnp.inf, mx_s.dtype)
            mn_s[...] = jnp.full(mn_s.shape, jnp.inf, mn_s.dtype)

        # conv1 as one long (B*TP, CKK) @ (CKK, nk_p) MXU matmul.
        # Conv bias is hoisted to _finalize (max/min commute with +const).
        pm = patch_ref[...].reshape(B * TP, CKK)
        feat = jnp.dot(pm, wc_ref[...], preferred_element_type=jnp.float32)
        feat = feat.reshape(B, TP, nk_p)
        mx_s[...] = jnp.maximum(mx_s[...], jnp.max(feat, axis=1))
        mn_s[...] = jnp.minimum(mn_s[...], jnp.min(feat, axis=1))

        @pl.when(p == n_p - 1)
        def _finalize():
            wdt = w1a_ref.dtype
            h1 = mx_s[...] + bc_ref[...]     # (B, nk_p) global max pool (+ hoisted bias)
            h2 = mn_s[...] + bc_ref[...]     # global min pool (= -maxpool(-h))
            z = (jnp.dot(h1.astype(wdt), w1a_ref[...],
                         preferred_element_type=jnp.float32)
                 + jnp.dot(h2.astype(wdt), w1b_ref[...],
                           preferred_element_type=jnp.float32)
                 + b1_ref[...])
            z = jnp.maximum(z, 0.0)
            # dropout: identity in eval/inference mode
            z = jnp.dot(z.astype(wdt), w2_ref[...],
                        preferred_element_type=jnp.float32) + b2_ref[...]
            z = jnp.maximum(z, 0.0)
            q = jnp.dot(z.astype(wdt), w3_ref[...],
                        preferred_element_type=jnp.float32) + b3_ref[...]
            out_ref[...] = q[None]           # (1, B, 128) lane-dense slab

    def const_spec(shape):
        return pl.BlockSpec(shape, lambda i, p: (0, 0))

    flops = (2 * N_pad * P_pad * CKK * nk_p
             + N_pad * (4 * nk_p * n1_p + 2 * n1_p * n2_p + 2 * n2_p * no_p))
    bytes_accessed = int(
        int(patches.size) * patches.dtype.itemsize
        + sum(int(a.size) * a.dtype.itemsize
              for a in (wconv_m, bconv_m, w1a, w1b, b1_m, w2_m, b2_m, w3_m, b3_m))
        + N_pad * no_p * 4)

    out = pl.pallas_call(
        kernel,
        out_shape=jax.ShapeDtypeStruct((N_pad // B, B, no_p), jnp.float32),
        grid_spec=pltpu.PrefetchScalarGridSpec(
            num_scalar_prefetch=0,
            grid=grid,
            in_specs=[
                pl.BlockSpec((B, TP, CKK), lambda i, p: (i, p, 0)),  # patches
                const_spec((CKK, nk_p)),    # conv weight
                const_spec((1, nk_p)),      # conv bias (added in finalize)
                const_spec((nk_p, n1_p)),   # fc1 weight (max-pool half)
                const_spec((nk_p, n1_p)),   # fc1 weight (min-pool half)
                const_spec((1, n1_p)),      # fc1 bias
                const_spec((n1_p, n2_p)),   # fc2 weight
                const_spec((1, n2_p)),      # fc2 bias
                const_spec((n2_p, no_p)),   # fc3 weight
                const_spec((1, no_p)),      # fc3 bias
            ],
            out_specs=pl.BlockSpec((1, B, no_p), lambda i, p: (i, 0, 0)),
            scratch_shapes=[pltpu.VMEM((B, nk_p), jnp.float32),
                            pltpu.VMEM((B, nk_p), jnp.float32)],
        ),
        compiler_params=pltpu.CompilerParams(
            dimension_semantics=("parallel", "arbitrary"),
            vmem_limit_bytes=min(int(vmem_bytes * 0.75), 96 * 1024 * 1024)),
        cost_estimate=pl.CostEstimate(flops=flops, transcendentals=0,
                                      bytes_accessed=bytes_accessed),
    )(patches, wconv_m, bconv_m, w1a, w1b, b1_m, w2_m, b2_m, w3_m, b3_m)
    return out.reshape(N_pad, no_p)[:N, 0:1]


if __name__ == "__main__":
    # Small shapes consistent with CNNIQA(ker_size=7, n_kers, n1_nodes, n2_nodes).
    N, C, H, W = 8, 3, 16, 16
    ker_size, n_kers, n1_nodes, n2_nodes = 7, 8, 32, 32

    key = jax.random.PRNGKey(0)
    keys = jax.random.split(key, 9)
    x = jax.random.normal(keys[0], (N, C, H, W), jnp.float32)
    wconv = 0.1 * jax.random.normal(keys[1], (n_kers, C, ker_size, ker_size), jnp.float32)
    bconv = 0.1 * jax.random.normal(keys[2], (n_kers,), jnp.float32)
    w1 = 0.1 * jax.random.normal(keys[3], (n1_nodes, 2 * n_kers), jnp.float32)
    b1 = 0.1 * jax.random.normal(keys[4], (n1_nodes,), jnp.float32)
    w2 = 0.1 * jax.random.normal(keys[5], (n2_nodes, n1_nodes), jnp.float32)
    b2 = 0.1 * jax.random.normal(keys[6], (n2_nodes,), jnp.float32)
    w3 = 0.1 * jax.random.normal(keys[7], (1, n2_nodes), jnp.float32)
    b3 = 0.1 * jax.random.normal(keys[8], (1,), jnp.float32)
    params = (wconv, bconv, w1, b1, w2, b2, w3, b3)

    # Pure-JAX reference (same semantics as the PyTorch forward, eval mode).
    ref_h = lax.conv_general_dilated(
        x, wconv, (1, 1), 'VALID',
        dimension_numbers=('NCHW', 'OIHW', 'NCHW')) + bconv.reshape(1, n_kers, 1, 1)
    h1 = ref_h.max(axis=(2, 3))
    h2 = ref_h.min(axis=(2, 3))
    hcat = jnp.concatenate([h1, h2], axis=1)
    r = jnp.maximum(hcat @ w1.T + b1, 0.0)
    r = jnp.maximum(r @ w2.T + b2, 0.0)
    q_ref = r @ w3.T + b3

    # f32 path: exercises batch blocking (B=4 -> 2 'parallel' steps) and the
    # P-tiled running max/min accumulator (p_tile=8 -> 13 'arbitrary' steps,
    # including an edge-replicated, maskless last tile).
    q_f32 = cnniqa_forward(x, params, batch_block=4, p_tile=8,
                           compute_dtype=jnp.float32)
    q_f32 = jax.block_until_ready(q_f32)
    assert q_f32.shape == (N, 1)
    assert jnp.allclose(q_f32, q_ref, rtol=1e-3, atol=1e-3), (q_f32, q_ref)

    # bf16 path (default): bf16 patch/weight DMA + native bf16 MXU, f32
    # accumulate.  NOTE: bf16 conv-input quantization gives ~1e-2 relative
    # error on the final score; acceptable for inference.
    q_bf16 = cnniqa_forward(x, params, batch_block=4, p_tile=None,
                            compute_dtype=jnp.bfloat16)
    q_bf16 = jax.block_until_ready(q_bf16)
    assert q_bf16.shape == (N, 1)
    assert jnp.allclose(q_bf16, q_ref, rtol=5e-2, atol=5e-2), (q_bf16, q_ref)

    print("KERNEL_OK")
</pallas_src>

<mosaic_0001>
module attributes {stable_mosaic.version = 11 : i64} {
  func.func @kernel(%arg0: i32, %arg1: i32, %arg2: memref<4x8x147xf32, #tpu.memory_space<vmem>>, %arg3: memref<147x128xf32, #tpu.memory_space<vmem>>, %arg4: memref<1x128xf32, #tpu.memory_space<vmem>>, %arg5: memref<128x128xf32, #tpu.memory_space<vmem>>, %arg6: memref<128x128xf32, #tpu.memory_space<vmem>>, %arg7: memref<1x128xf32, #tpu.memory_space<vmem>>, %arg8: memref<128x128xf32, #tpu.memory_space<vmem>>, %arg9: memref<1x128xf32, #tpu.memory_space<vmem>>, %arg10: memref<128x128xf32, #tpu.memory_space<vmem>>, %arg11: memref<1x128xf32, #tpu.memory_space<vmem>>, %arg12: memref<1x4x128xf32, #tpu.memory_space<vmem>>, %arg13: memref<4x128xf32, #tpu.memory_space<vmem>>, %arg14: memref<4x128xf32, #tpu.memory_space<vmem>>) attributes {dimension_semantics = [#tpu.dimension_semantics<parallel>, #tpu.dimension_semantics<arbitrary>], iteration_bounds = array<i64: 2, 13>, scalar_prefetch = 0 : i64, scratch_operands = 2 : i64, tpu.core_type = #tpu.core_type<tc>, window_params = [{transform_indices = @transform_0, window_bounds = array<i64: 4, 8, 147>}, {pipeline_mode = #tpu.pipeline_mode<synchronous>, transform_indices = @transform_1, window_bounds = array<i64: 147, 128>}, {pipeline_mode = #tpu.pipeline_mode<synchronous>, transform_indices = @transform_2, window_bounds = array<i64: 1, 128>}, {pipeline_mode = #tpu.pipeline_mode<synchronous>, transform_indices = @transform_3, window_bounds = array<i64: 128, 128>}, {pipeline_mode = #tpu.pipeline_mode<synchronous>, transform_indices = @transform_4, window_bounds = array<i64: 128, 128>}, {pipeline_mode = #tpu.pipeline_mode<synchronous>, transform_indices = @transform_5, window_bounds = array<i64: 1, 128>}, {pipeline_mode = #tpu.pipeline_mode<synchronous>, transform_indices = @transform_6, window_bounds = array<i64: 128, 128>}, {pipeline_mode = #tpu.pipeline_mode<synchronous>, transform_indices = @transform_7, window_bounds = array<i64: 1, 128>}, {pipeline_mode = #tpu.pipeline_mode<synchronous>, transform_indices = @transform_8, window_bounds = array<i64: 128, 128>}, {pipeline_mode = #tpu.pipeline_mode<synchronous>, transform_indices = @transform_9, window_bounds = array<i64: 1, 128>}, {transform_indices = @transform_10, window_bounds = array<i64: 1, 4, 128>}]} {
    %c0_i32 = arith.constant 0 : i32
    %0 = arith.cmpi eq, %arg1, %c0_i32 : i32
    %1 = arith.extui %0 : i1 to i32
    %c0_i32_0 = arith.constant 0 : i32
    %2 = arith.cmpi ne, %1, %c0_i32_0 : i32
    scf.if %2 {
      %cst_16 = arith.constant 0xFF800000 : f32
      %19 = vector.broadcast %cst_16 : f32 to vector<4x128xf32>
      %c0_17 = arith.constant 0 : index
      %c0_18 = arith.constant 0 : index
      %20 = vector.load %arg13[%c0_17, %c0_18] : memref<4x128xf32, #tpu.memory_space<vmem>>, vector<4x128xf32>
      tpu.vector_store %arg13[%c0_17, %c0_18], %19 {strides = array<i32>} : memref<4x128xf32, #tpu.memory_space<vmem>>, vector<4x128xf32>,
      %cst_19 = arith.constant 0x7F800000 : f32
      %21 = vector.broadcast %cst_19 : f32 to vector<4x128xf32>
      %c0_20 = arith.constant 0 : index
      %c0_21 = arith.constant 0 : index
      %22 = vector.load %arg14[%c0_20, %c0_21] : memref<4x128xf32, #tpu.memory_space<vmem>>, vector<4x128xf32>
      tpu.vector_store %arg14[%c0_20, %c0_21], %21 {strides = array<i32>} : memref<4x128xf32, #tpu.memory_space<vmem>>, vector<4x128xf32>,
    } else {
    }
    %c0 = arith.constant 0 : index
    %c0_1 = arith.constant 0 : index
    %c0_2 = arith.constant 0 : index
    %3 = vector.load %arg2[%c0, %c0_1, %c0_2] : memref<4x8x147xf32, #tpu.memory_space<vmem>>, vector<4x8x147xf32>
    %4 = vector.shape_cast %3 : vector<4x8x147xf32> to vector<32x147xf32>
    %c0_3 = arith.constant 0 : index
    %c0_4 = arith.constant 0 : index
    %5 = vector.load %arg3[%c0_3, %c0_4] : memref<147x128xf32, #tpu.memory_space<vmem>>, vector<147x128xf32>
    %cst = arith.constant dense<0.000000e+00> : vector<32x128xf32>
    %6 = tpu.matmul %4, %5, %cst {dimension_numbers = #tpu.dot_dimension_numbers<[1], [0], [0], [1], [0, 0, 1, 1], [], []>} : vector<32x147xf32>, vector<147x128xf32>, vector<32x128xf32> -> vector<32x128xf32>
    %7 = vector.shape_cast %6 : vector<32x128xf32> to vector<4x8x128xf32>
    %c0_5 = arith.constant 0 : index
    %c0_6 = arith.constant 0 : index
    %8 = vector.load %arg13[%c0_5, %c0_6] : memref<4x128xf32, #tpu.memory_space<vmem>>, vector<4x128xf32>
    %cst_7 = arith.constant dense<0xFF800000> : vector<4x128xf32>
    %9 = vector.multi_reduction <maximumf>, %7, %cst_7 [1] : vector<4x8x128xf32> to vector<4x128xf32>
    %10 = arith.maximumf %8, %9 : vector<4x128xf32>
    %c0_8 = arith.constant 0 : index
    %c0_9 = arith.constant 0 : index
    %11 = vector.load %arg13[%c0_8, %c0_9] : memref<4x128xf32, #tpu.memory_space<vmem>>, vector<4x128xf32>
    tpu.vector_store %arg13[%c0_8, %c0_9], %10 {strides = array<i32>} : memref<4x128xf32, #tpu.memory_space<vmem>>, vector<4x128xf32>,
    %c0_10 = arith.constant 0 : index
    %c0_11 = arith.constant 0 : index
    %12 = vector.load %arg14[%c0_10, %c0_11] : memref<4x128xf32, #tpu.memory_space<vmem>>, vector<4x128xf32>
    %cst_12 = arith.constant dense<0x7F800000> : vector<4x128xf32>
    %13 = vector.multi_reduction <minimumf>, %7, %cst_12 [1] : vector<4x8x128xf32> to vector<4x128xf32>
    %14 = arith.minimumf %12, %13 : vector<4x128xf32>
    %c0_13 = arith.constant 0 : index
    %c0_14 = arith.constant 0 : index
    %15 = vector.load %arg14[%c0_13, %c0_14] : memref<4x128xf32, #tpu.memory_space<vmem>>, vector<4x128xf32>
    tpu.vector_store %arg14[%c0_13, %c0_14], %14 {strides = array<i32>} : memref<4x128xf32, #tpu.memory_space<vmem>>, vector<4x128xf32>,
    %c12_i32 = arith.constant 12 : i32
    %16 = arith.cmpi eq, %arg1, %c12_i32 : i32
    %17 = arith.extui %16 : i1 to i32
    %c0_i32_15 = arith.constant 0 : i32
    %18 = arith.cmpi ne, %17, %c0_i32_15 : i32
    scf.if %18 {
      %c0_16 = arith.constant 0 : index
      %c0_17 = arith.constant 0 : index
      %19 = vector.load %arg13[%c0_16, %c0_17] : memref<4x128xf32, #tpu.memory_space<vmem>>, vector<4x128xf32>
      %c0_18 = arith.constant 0 : index
      %c0_19 = arith.constant 0 : index
      %20 = vector.load %arg4[%c0_18, %c0_19] : memref<1x128xf32, #tpu.memory_space<vmem>>, vector<1x128xf32>
      %21 = vector.broadcast %20 : vector<1x128xf32> to vector<4x128xf32>
      %22 = arith.addf %19, %21 : vector<4x128xf32>
      %c0_20 = arith.constant 0 : index
      %c0_21 = arith.constant 0 : index
      %23 = vector.load %arg14[%c0_20, %c0_21] : memref<4x128xf32, #tpu.memory_space<vmem>>, vector<4x128xf32>
      %c0_22 = arith.constant 0 : index
      %c0_23 = arith.constant 0 : index
      %24 = vector.load %arg4[%c0_22, %c0_23] : memref<1x128xf32, #tpu.memory_space<vmem>>, vector<1x128xf32>
      %25 = vector.broadcast %24 : vector<1x128xf32> to vector<4x128xf32>
      %26 = arith.addf %23, %25 : vector<4x128xf32>
      %c0_24 = arith.constant 0 : index
      %c0_25 = arith.constant 0 : index
      %27 = vector.load %arg5[%c0_24, %c0_25] : memref<128x128xf32, #tpu.memory_space<vmem>>, vector<128x128xf32>
      %cst_26 = arith.constant dense<0.000000e+00> : vector<4x128xf32>
      %28 = tpu.matmul %22, %27, %cst_26 {dimension_numbers = #tpu.dot_dimension_numbers<[1], [0], [0], [1], [0, 0, 1, 1], [], []>} : vector<4x128xf32>, vector<128x128xf32>, vector<4x128xf32> -> vector<4x128xf32>
      %c0_27 = arith.constant 0 : index
      %c0_28 = arith.constant 0 : index
      %29 = vector.load %arg6[%c0_27, %c0_28] : memref<128x128xf32, #tpu.memory_space<vmem>>, vector<128x128xf32>
      %cst_29 = arith.constant dense<0.000000e+00> : vector<4x128xf32>
      %30 = tpu.matmul %26, %29, %cst_29 {dimension_numbers = #tpu.dot_dimension_numbers<[1], [0], [0], [1], [0, 0, 1, 1], [], []>} : vector<4x128xf32>, vector<128x128xf32>, vector<4x128xf32> -> vector<4x128xf32>
      %31 = arith.addf %28, %30 : vector<4x128xf32>
      %c0_30 = arith.constant 0 : index
      %c0_31 = arith.constant 0 : index
      %32 = vector.load %arg7[%c0_30, %c0_31] : memref<1x128xf32, #tpu.memory_space<vmem>>, vector<1x128xf32>
      %33 = vector.broadcast %32 : vector<1x128xf32> to vector<4x128xf32>
      %34 = arith.addf %31, %33 : vector<4x128xf32>
      %cst_32 = arith.constant 0.000000e+00 : f32
      %35 = vector.broadcast %cst_32 : f32 to vector<4x128xf32>
      %36 = arith.maximumf %34, %35 : vector<4x128xf32>
      %c0_33 = arith.constant 0 : index
      %c0_34 = arith.constant 0 : index
      %37 = vector.load %arg8[%c0_33, %c0_34] : memref<128x128xf32, #tpu.memory_space<vmem>>, vector<128x128xf32>
      %cst_35 = arith.constant dense<0.000000e+00> : vector<4x128xf32>
      %38 = tpu.matmul %36, %37, %cst_35 {dimension_numbers = #tpu.dot_dimension_numbers<[1], [0], [0], [1], [0, 0, 1, 1], [], []>} : vector<4x128xf32>, vector<128x128xf32>, vector<4x128xf32> -> vector<4x128xf32>
      %c0_36 = arith.constant 0 : index
      %c0_37 = arith.constant 0 : index
      %39 = vector.load %arg9[%c0_36, %c0_37] : memref<1x128xf32, #tpu.memory_space<vmem>>, vector<1x128xf32>
      %40 = vector.broadcast %39 : vector<1x128xf32> to vector<4x128xf32>
      %41 = arith.addf %38, %40 : vector<4x128xf32>
      %cst_38 = arith.constant 0.000000e+00 : f32
      %42 = vector.broadcast %cst_38 : f32 to vector<4x128xf32>
      %43 = arith.maximumf %41, %42 : vector<4x128xf32>
      %c0_39 = arith.constant 0 : index
      %c0_40 = arith.constant 0 : index
      %44 = vector.load %arg10[%c0_39, %c0_40] : memref<128x128xf32, #tpu.memory_space<vmem>>, vector<128x128xf32>
      %cst_41 = arith.constant dense<0.000000e+00> : vector<4x128xf32>
      %45 = tpu.matmul %43, %44, %cst_41 {dimension_numbers = #tpu.dot_dimension_numbers<[1], [0], [0], [1], [0, 0, 1, 1], [], []>} : vector<4x128xf32>, vector<128x128xf32>, vector<4x128xf32> -> vector<4x128xf32>
      %c0_42 = arith.constant 0 : index
      %c0_43 = arith.constant 0 : index
      %46 = vector.load %arg11[%c0_42, %c0_43] : memref<1x128xf32, #tpu.memory_space<vmem>>, vector<1x128xf32>
      %47 = vector.broadcast %46 : vector<1x128xf32> to vector<4x128xf32>
      %48 = arith.addf %45, %47 : vector<4x128xf32>
      %49 = vector.shape_cast %48 : vector<4x128xf32> to vector<1x4x128xf32>
      %c0_44 = arith.constant 0 : index
      %c0_45 = arith.constant 0 : index
      %c0_46 = arith.constant 0 : index
      %50 = vector.load %arg12[%c0_44, %c0_45, %c0_46] : memref<1x4x128xf32, #tpu.memory_space<vmem>>, vector<1x4x128xf32>
      tpu.vector_store %arg12[%c0_44, %c0_45, %c0_46], %49 {strides = array<i32>} : memref<1x4x128xf32, #tpu.memory_space<vmem>>, vector<1x4x128xf32>,
    } else {
    }
    return
  }
  func.func @transform_0(%arg0: i32, %arg1: i32) -> (i32, i32, i32) {
    %c0_i32 = arith.constant 0 : i32
    %c0_i32_0 = arith.constant 0 : i32
    return %arg0, %arg1, %c0_i32 : i32, i32, i32
  }
  func.func @transform_1(%arg0: i32, %arg1: i32) -> (i32, i32) {
    %c0_i32 = arith.constant 0 : i32
    %c0_i32_0 = arith.constant 0 : i32
    %c0_i32_1 = arith.constant 0 : i32
    return %c0_i32, %c0_i32_0 : i32, i32
  }
  func.func @transform_2(%arg0: i32, %arg1: i32) -> (i32, i32) {
    %c0_i32 = arith.constant 0 : i32
    %c0_i32_0 = arith.constant 0 : i32
    %c0_i32_1 = arith.constant 0 : i32
    return %c0_i32, %c0_i32_0 : i32, i32
  }
  func.func @transform_3(%arg0: i32, %arg1: i32) -> (i32, i32) {
    %c0_i32 = arith.constant 0 : i32
    %c0_i32_0 = arith.constant 0 : i32
    %c0_i32_1 = arith.constant 0 : i32
    return %c0_i32, %c0_i32_0 : i32, i32
  }
  func.func @transform_4(%arg0: i32, %arg1: i32) -> (i32, i32) {
    %c0_i32 = arith.constant 0 : i32
    %c0_i32_0 = arith.constant 0 : i32
    %c0_i32_1 = arith.constant 0 : i32
    return %c0_i32, %c0_i32_0 : i32, i32
  }
  func.func @transform_5(%arg0: i32, %arg1: i32) -> (i32, i32) {
    %c0_i32 = arith.constant 0 : i32
    %c0_i32_0 = arith.constant 0 : i32
    %c0_i32_1 = arith.constant 0 : i32
    return %c0_i32, %c0_i32_0 : i32, i32
  }
  func.func @transform_6(%arg0: i32, %arg1: i32) -> (i32, i32) {
    %c0_i32 = arith.constant 0 : i32
    %c0_i32_0 = arith.constant 0 : i32
    %c0_i32_1 = arith.constant 0 : i32
    return %c0_i32, %c0_i32_0 : i32, i32
  }
  func.func @transform_7(%arg0: i32, %arg1: i32) -> (i32, i32) {
    %c0_i32 = arith.constant 0 : i32
    %c0_i32_0 = arith.constant 0 : i32
    %c0_i32_1 = arith.constant 0 : i32
    return %c0_i32, %c0_i32_0 : i32, i32
  }
  func.func @transform_8(%arg0: i32, %arg1: i32) -> (i32, i32) {
    %c0_i32 = arith.constant 0 : i32
    %c0_i32_0 = arith.constant 0 : i32
    %c0_i32_1 = arith.constant 0 : i32
    return %c0_i32, %c0_i32_0 : i32, i32
  }
  func.func @transform_9(%arg0: i32, %arg1: i32) -> (i32, i32) {
    %c0_i32 = arith.constant 0 : i32
    %c0_i32_0 = arith.constant 0 : i32
    %c0_i32_1 = arith.constant 0 : i32
    return %c0_i32, %c0_i32_0 : i32, i32
  }
  func.func @transform_10(%arg0: i32, %arg1: i32) -> (i32, i32, i32) {
    %c0_i32 = arith.constant 0 : i32
    %c0_i32_0 = arith.constant 0 : i32
    %c0_i32_1 = arith.constant 0 : i32
    return %arg0, %c0_i32, %c0_i32_0 : i32, i32, i32
  }
}

</mosaic_0001>

<bundles_post_ra>
// kernel: tpu_custom_call.1
= control target key start
LH: loop header
LB: loop body
LE: loop exit
PB: predicated region body
PF: predicated region fallthrough
CT: control target
= control target key end

     0   :  { %s2926_s0 = inlined_call_operand.hbm [shape: f32[8,104,147], index: 0, kind: input, shape index: {}]   ;;  %s2927_s1 = inlined_call_operand.hbm [shape: f32[147,128], index: 1, kind: input, shape index: {}]   ;;  %s2928_s2 = inlined_call_operand.hbm [shape: f32[1,128], index: 2, kind: input, shape index: {}]   ;;  %s2929_s3 = inlined_call_operand.hbm [shape: f32[128,128], index: 3, kind: input, shape index: {}]   ;;  %s2930_s4 = inlined_call_operand.hbm [shape: f32[128,128], index: 4, kind: input, shape index: {}]   ;;  %s2931_s5 = inlined_call_operand.hbm [shape: f32[1,128], index: 5, kind: input, shape index: {}]   ;;  %s2932_s6 = inlined_call_operand.hbm [shape: f32[128,128], index: 6, kind: input, shape index: {}]   ;;  %s2933_s7 = inlined_call_operand.hbm [shape: f32[1,128], index: 7, kind: input, shape index: {}]   ;;  %s2934_s8 = inlined_call_operand.hbm [shape: f32[128,128], index: 8, kind: input, shape index: {}]   ;;  %s2935_s9 = inlined_call_operand.hbm [shape: f32[1,128], index: 9, kind: input, shape index: {}]   ;;  %s2936_s10 = inlined_call_operand.hbm [shape: f32[2,4,128], index: 10, kind: output, shape index: {}]  }
   0x1   :  { %2953 = sst [smem:[#allocation36_spill]] %s2926_s0 }
   0x2   :  { %2954 = sst [smem:[#allocation37_spill]] %s2927_s1 }
   0x3   :  { %2955 = sst [smem:[#allocation38_spill]] %s2928_s2 }
   0x4   :  { %2956 = sst [smem:[#allocation39_spill]] %s2929_s3 }
   0x5   :  { %2957 = sst [smem:[#allocation40_spill]] %s2930_s4 }
   0x6   :  { %2958 = sst [smem:[#allocation41_spill]] %s2931_s5 }
   0x7   :  { %2959 = sst [smem:[#allocation42_spill]] %s2936_s10 }
   0x8   :  { %15 = vsyncpa [#allocation5], 0 }
   0x9   :  { %17 = vsyncpa [#allocation5 + $0x1], 0 }
   0xa   :  { %18 = vsyncpa [#allocation8], 0 }
   0xb   :  { %19 = vsyncpa [#allocation11], 0 }
   0xc   :  { %20 = vsyncpa [#allocation14], 0 }
   0xd   :  { %21 = vsyncpa [#allocation17], 0 }
   0xe   :  { %22 = vsyncpa [#allocation20], 0 }
   0xf   :  { %23 = vsyncpa [#allocation6], 0 }
  0x10   :  { %25 = vsyncpa [#allocation6 + $0x1], 0  ;;  %s2401_s13 = smov 0   ;;  %s2403_s14 = smov 0  }
  0x11   :  { %s2405_s15 = smov 0   ;;  %s2407_s16 = smov 0  }
  0x12   :  { %s2409_s17 = smov 0   ;;  %s2411_s18 = smov 0  }
  0x13   :  { %s2413_s19 = smov 0   ;;  %s2415_s20 = smov 0  }
  0x14   :  { %s2417_s21 = smov 0   ;;  %s2419_s22 = smov 0  }
  0x15   :  { %s2421_s23 = smov 0  }
  0x16 LB: > { %2960 = sst [smem:[#allocation29_spill]] %s2281_s13  ;;  %s2937_s24 = sadd.s32 4294967295, %s2321_s23   ;;  %s2321_s23 = sphi %s2421_s23, %s31_s23   ;;  %s2317_s22 = sphi %s2419_s22, %s3012_s22   ;;  %s2313_s21 = sphi %s2417_s21, %s3011_s21   ;;  %s2309_s20 = sphi %s2415_s20, %s3010_s20   ;;  %s2305_s19 = sphi %s2413_s19, %s3009_s19   ;;  %s2301_s18 = sphi %s2411_s18, %s3008_s18   ;;  %s2297_s17 = sphi %s2409_s17, %s3007_s17   ;;  %s2293_s16 = sphi %s2407_s16, %s3006_s16   ;;  %s2289_s15 = sphi %s2405_s15, %s3005_s15   ;;  %s2285_s14 = sphi %s2403_s14, %s3003_s14   ;;  %s2281_s13 = sphi %s2401_s13, %s3002_s13  }
  0x17   : > { %2961 = sst [smem:[#allocation30_spill]] %s2285_s14  ;;  %p1297_p0 = scmp.ge.s32.totalorder %s2321_s23, 1 }
  0x18   : > { %2962 = sst [smem:[#allocation31_spill]] %s2289_s15  ;;  %p2460_p1 = scmp.eq.s32.totalorder %s2937_s24, 0 }
  0x19   : > { %2963 = sst [smem:[#allocation32_spill]] %s2305_s19  ;;  %p291_p2 = scmp.lt.s32.totalorder %s2321_s23, 27 }
  0x1a   : > { %2964 = sst [smem:[#allocation33_spill]] %s2309_s20  ;;  %s2323_s27 = smov [#allocation7]  }
  0x1b   : > { %s2965_s25 = scalar_select %p2460_p1, 1, 0 }
  0x1c   : > { %p2465_p3 = pnand %p1297_p0, %p291_p2  ;;  %s303_s28 = sshll.u32 %s2323_s27, 4  ;;  %s2469_s28 = int_to_ptr.vmem [resolvable:$true] %s303_s28 }
  0x1d   : > { %2966 = sst [smem:[#allocation34_spill]] %s2965_s25  ;;  %s2324_s30 = smov [#allocation10]  }
  0x1e   : > { %s2967_s26 = scalar_select %p2465_p3, 1, 0 }
  0x1f   : > { %p1732_p4 = pneg %p2465_p3  ;;  %s327_s11 = sshll.u32 %s2324_s30, 4  ;;  %s2479_s11 = int_to_ptr.vmem [resolvable:$true] %s327_s11 }
  0x20   : > { %2968 = sst [smem:[#allocation35_spill]] %s2967_s26  ;;  %s2325_s12 = smov [#allocation13]  }
  0x21   : > { %p2475_p5 = pnand %p1732_p4, %p2460_p1  ;;  %s2481_s24 = sshll.u32 %s2325_s12, 4  ;;  %s355_s24 = int_to_ptr.vmem [resolvable:$true] %s2481_s24 }
  0x22   : > { %s2970_s1 = sld [smem:[#allocation37_spill]] }
  0x23   : > { %p2491_p7 = pneg %p2475_p5 }
  0x28   : > { %s1897_s27 = scalar_lea.hbm %s2970_s1, 2432 }
  0x29   : > { %p1898_p6 = scmp.ne.s32.totalorder %s2970_s1, %s1897_s27  ;;  %p1904_p10 = scmp.lt.u32.totalorder %s1897_s27, %s2970_s1 }
  0x2b   : > { %p1900_p8 = pnand %p2491_p7, %p1898_p6 }
  0x2d   : > { %p1901_p9 = pneg %p1900_p8 }
  0x2f   : > { %p1906_p11 = pnand %p1904_p10, %p1901_p9 }
  0x31   : > { %1909 = shalt.err (!%p1906_p11)
}
  0x32   : > { %s1910_s10 = scalar_lea.vmem %s2469_s28, 2432  ;;  %p1918_p2 = scmp.lt.s32.totalorder %s2469_s28, %s2469_s28 }
  0x33   : > { %p1911_p12 = scmp.ne.s32.totalorder %s2469_s28, %s1910_s10  ;;  %p1919_p4 = scmp.lt.s32.totalorder %s1910_s10, %s1910_s10 }
  0x35   : > { %p1913_p13 = pnand %p1911_p12, %p2491_p7  ;;  %p1920_p6 = por %p1919_p4, %p1918_p2 }
  0x37   : > { %p1914_p0 = pneg %p1913_p13 }
  0x39   : > { %p1921_p8 = pnand %p1920_p6, %p1914_p0 }
  0x3b   : > { %1924 = shalt.err (!%p1921_p8)
}
  0x3c   : > { %s2949_s19 = smov 128   ;;  %s2327_s20 = smov 8  }
  0x3d   : > { %1735 = dma.hbm_to_vmem [thread:$0]  (!%p2475_p5), %s2970_s1, 2432, %s2469_s28, [#allocation8], %s2949_s19, %s2949_s19, %s2327_s20  }
  0x3e   : > { %s2972_s3 = sld [smem:[#allocation39_spill]] }
  0x44   : > { %s1925_s10 = scalar_lea.hbm %s2972_s3, 2048 }
  0x45   : > { %p1926_p9 = scmp.ne.s32.totalorder %s2972_s3, %s1925_s10  ;;  %p1932_p12 = scmp.lt.u32.totalorder %s1925_s10, %s2972_s3 }
  0x47   : > { %p1928_p10 = pnand %p1926_p9, %p2491_p7 }
  0x49   : > { %p1929_p11 = pneg %p1928_p10 }
  0x4b   : > { %p1934_p13 = pnand %p1932_p12, %p1929_p11 }
  0x4d   : > { %1937 = shalt.err (!%p1934_p13)
}
  0x4e   : > { %s1938_s28 = scalar_lea.vmem %s2479_s11, 2048  ;;  %p1946_p6 = scmp.lt.s32.totalorder %s2479_s11, %s2479_s11 }
  0x4f   : > { %p1939_p0 = scmp.ne.s32.totalorder %s2479_s11, %s1938_s28  ;;  %p1947_p8 = scmp.lt.s32.totalorder %s1938_s28, %s1938_s28 }
  0x51   : > { %p1941_p2 = pnand %p1939_p0, %p2491_p7  ;;  %p1948_p9 = por %p1947_p8, %p1946_p6 }
  0x53   : > { %p1942_p4 = pneg %p1941_p2 }
  0x55   : > { %p1949_p10 = pnand %p1948_p9, %p1942_p4 }
  0x57   : > { %1952 = shalt.err (!%p1949_p10)
}
  0x58   : > { %1741 = dma.hbm_to_vmem [thread:$0]  (!%p2475_p5), %s2972_s3, 2048, %s2479_s11, [#allocation11], %s2949_s19, %s2949_s19, %s2327_s20  }
  0x59   : > { %s2973_s5 = sld [smem:[#allocation41_spill]] }
  0x5f   : > { %s1953_s26 = scalar_lea.hbm %s2973_s5, 16 }
  0x60   : > { %p1954_p11 = scmp.ne.s32.totalorder %s2973_s5, %s1953_s26  ;;  %p1960_p0 = scmp.lt.u32.totalorder %s1953_s26, %s2973_s5 }
  0x62   : > { %p1956_p12 = pnand %p1954_p11, %p2491_p7 }
  0x64   : > { %p1957_p13 = pneg %p1956_p12 }
  0x66   : > { %p1962_p2 = pnand %p1960_p0, %p1957_p13 }
  0x68   : > { %1965 = shalt.err (!%p1962_p2)
}
  0x69   : > { %s1966_s28 = scalar_lea.vmem %s355_s24, 16  ;;  %s1973_s11 = scalar_lea.vmem %s355_s24, 32 }
  0x6a   : > { %p1967_p4 = scmp.ne.s32.totalorder %s355_s24, %s1966_s28  ;;  %p1974_p9 = scmp.lt.s32.totalorder %s355_s24, %s355_s24 }
  0x6b   : > { %p1975_p10 = scmp.lt.s32.totalorder %s1973_s11, %s1966_s28 }
  0x6c   : > { %p1969_p6 = pnand %p1967_p4, %p2491_p7 }
  0x6d   : > { %p1976_p3 = por %p1975_p10, %p1974_p9 }
  0x6e   : > { %p1970_p8 = pneg %p1969_p6 }
  0x70   : > { %p1977_p1 = pnand %p1976_p3, %p1970_p8 }
  0x72   : > { %1980 = shalt.err (!%p1977_p1)
}
  0x73   : > { %1747 = dma.hbm_to_vmem [thread:$0]  (!%p2475_p5), %s2973_s5, 16, %s355_s24, [#allocation14]  }
  0x74   : > { %s2328_s15 = smov [#allocation16]   ;;  %s2329_s26 = smov [#allocation9]  }
  0x75   : > { %s378_s25 = sshll.u32 %s2328_s15, 4  ;;  %s317_s27 = sshll.u32 %s2329_s26, 4  ;;  %s379_s25 = int_to_ptr.vmem [resolvable:$true] %s378_s25  ;;  %s318_s27 = int_to_ptr.vmem [resolvable:$true] %s317_s27 }
  0x76   : > { %s1981_s10 = scalar_lea.hbm %s2933_s7, 16 }
  0x77   : > { %p1982_p1 = scmp.ne.s32.totalorder %s2933_s7, %s1981_s10  ;;  %p1988_p12 = scmp.lt.u32.totalorder %s1981_s10, %s2933_s7 }
  0x79   : > { %p1984_p3 = pnand %p1982_p1, %p2491_p7 }
  0x7b   : > { %p1985_p11 = pneg %p1984_p3 }
  0x7d   : > { %p1990_p13 = pnand %p1988_p12, %p1985_p11 }
  0x7f   : > { %1993 = shalt.err (!%p1990_p13)
}
  0x80   : > { %s1994_s24 = scalar_lea.vmem %s379_s25, 16  ;;  %s2001_s14 = scalar_lea.vmem %s379_s25, 32 }
  0x81   : > { %p1995_p0 = scmp.ne.s32.totalorder %s379_s25, %s1994_s24  ;;  %p2002_p6 = scmp.lt.s32.totalorder %s379_s25, %s379_s25 }
  0x82   : > { %p2003_p8 = scmp.lt.s32.totalorder %s2001_s14, %s1994_s24 }
  0x83   : > { %p1997_p2 = pnand %p1995_p0, %p2491_p7 }
  0x84   : > { %p2004_p9 = por %p2003_p8, %p2002_p6 }
  0x85   : > { %p1998_p4 = pneg %p1997_p2 }
  0x87   : > { %p2005_p10 = pnand %p2004_p9, %p1998_p4 }
  0x89   : > { %2008 = shalt.err (!%p2005_p10)
}
  0x8a   : > { %1753 = dma.hbm_to_vmem [thread:$0]  (!%p2475_p5), %s2933_s7, 16, %s379_s25, [#allocation17]  }
  0x8b   : > { %s2974_s2 = sld [smem:[#allocation38_spill]] }
  0x91   : > { %s2009_s12 = scalar_lea.hbm %s2974_s2, 16 }
  0x92   : > { %p2010_p1 = scmp.ne.s32.totalorder %s2974_s2, %s2009_s12  ;;  %p2016_p12 = scmp.lt.u32.totalorder %s2009_s12, %s2974_s2 }
  0x94   : > { %p2012_p3 = pnand %p2010_p1, %p2491_p7 }
  0x96   : > { %p2013_p11 = pneg %p2012_p3 }
  0x98   : > { %p2018_p13 = pnand %p2016_p12, %p2013_p11 }
  0x9a   : > { %2021 = shalt.err (!%p2018_p13)
}
  0x9b   : > { %s2022_s24 = scalar_lea.vmem %s318_s27, 16  ;;  %s2029_s25 = scalar_lea.vmem %s318_s27, 32 }
  0x9c   : > { %p2023_p0 = scmp.ne.s32.totalorder %s318_s27, %s2022_s24  ;;  %p2030_p6 = scmp.lt.s32.totalorder %s318_s27, %s318_s27 }
  0x9d   : > { %p2031_p8 = scmp.lt.s32.totalorder %s2029_s25, %s2022_s24 }
  0x9e   : > { %p2025_p2 = pnand %p2023_p0, %p2491_p7 }
  0x9f   : > { %p2032_p9 = por %p2031_p8, %p2030_p6 }
  0xa0   : > { %p2026_p4 = pneg %p2025_p2 }
  0xa2   : > { %p2033_p10 = pnand %p2032_p9, %p2026_p4 }
  0xa4   : > { %2036 = shalt.err (!%p2033_p10)
}
  0xa5   : > { %1738 = dma.hbm_to_vmem [thread:$0]  (!%p2475_p5), %s2974_s2, 16, %s318_s27, [#allocation8]  }
  0xa6   : > { %s2330_s26 = smov [#allocation12]   ;;  %s2331_s30 = smov [#allocation15]  }
  0xa7   : > { %s340_s19 = sshll.u32 %s2330_s26, 4  ;;  %s364_s12 = sshll.u32 %s2331_s30, 4  ;;  %s341_s19 = int_to_ptr.vmem [resolvable:$true] %s340_s19  ;;  %s365_s12 = int_to_ptr.vmem [resolvable:$true] %s364_s12 }
  0xa8   : > { %s2975_s4 = sld [smem:[#allocation40_spill]] }
  0xae   : > { %s2037_s11 = scalar_lea.hbm %s2975_s4, 2048 }
  0xaf   : > { %p2038_p1 = scmp.ne.s32.totalorder %s2975_s4, %s2037_s11  ;;  %p2044_p12 = scmp.lt.u32.totalorder %s2037_s11, %s2975_s4 }
  0xb1   : > { %p2040_p3 = pnand %p2038_p1, %p2491_p7 }
  0xb3   : > { %p2041_p11 = pneg %p2040_p3 }
  0xb5   : > { %p2046_p13 = pnand %p2044_p12, %p2041_p11 }
  0xb7   : > { %2049 = shalt.err (!%p2046_p13)
}
  0xb8   : > { %s2050_s27 = scalar_lea.vmem %s341_s19, 2048  ;;  %p2058_p6 = scmp.lt.s32.totalorder %s341_s19, %s341_s19 }
  0xb9   : > { %p2051_p0 = scmp.ne.s32.totalorder %s341_s19, %s2050_s27  ;;  %p2059_p8 = scmp.lt.s32.totalorder %s2050_s27, %s2050_s27 }
  0xbb   : > { %p2053_p2 = pnand %p2051_p0, %p2491_p7  ;;  %p2060_p9 = por %p2059_p8, %p2058_p6 }
  0xbd   : > { %p2054_p4 = pneg %p2053_p2 }
  0xbf   : > { %p2061_p10 = pnand %p2060_p9, %p2054_p4 }
  0xc1   : > { %2064 = shalt.err (!%p2061_p10)
}
  0xc2   : > { %s2976_s15 = smov 128   ;;  %s2065_s11 = scalar_lea.hbm %s2932_s6, 2048 }
  0xc3   : > { %1744 = dma.hbm_to_vmem [thread:$0]  (!%p2475_p5), %s2975_s4, 2048, %s341_s19, [#allocation11], %s2976_s15, %s2976_s15, %s2327_s20  }
  0xc4   : > { %p2066_p1 = scmp.ne.s32.totalorder %s2932_s6, %s2065_s11  ;;  %p2072_p12 = scmp.lt.u32.totalorder %s2065_s11, %s2932_s6 }
  0xc6   : > { %p2068_p3 = pnand %p2066_p1, %p2491_p7 }
  0xc8   : > { %p2069_p11 = pneg %p2068_p3 }
  0xca   : > { %p2074_p13 = pnand %p2072_p12, %p2069_p11 }
  0xcc   : > { %2077 = shalt.err (!%p2074_p13)
}
  0xcd   : > { %s2078_s27 = scalar_lea.vmem %s365_s12, 2048  ;;  %p2086_p6 = scmp.lt.s32.totalorder %s365_s12, %s365_s12 }
  0xce   : > { %p2079_p0 = scmp.ne.s32.totalorder %s365_s12, %s2078_s27  ;;  %p2087_p8 = scmp.lt.s32.totalorder %s2078_s27, %s2078_s27 }
  0xd0   : > { %p2081_p2 = pnand %p2079_p0, %p2491_p7  ;;  %p2088_p9 = por %p2087_p8, %p2086_p6 }
  0xd2   : > { %p2082_p4 = pneg %p2081_p2 }
  0xd4   : > { %p2089_p10 = pnand %p2088_p9, %p2082_p4 }
  0xd6   : > { %2092 = shalt.err (!%p2089_p10)
}
  0xd7   : > { %1750 = dma.hbm_to_vmem [thread:$0]  (!%p2475_p5), %s2932_s6, 2048, %s365_s12, [#allocation14], %s2976_s15, %s2976_s15, %s2327_s20  }
  0xd8   : > { %s2332_s30 = smov [#allocation18]   ;;  %s2333_s28 = smov [#allocation19]  }
  0xd9   : > { %s388_s10 = sshll.u32 %s2332_s30, 4  ;;  %s402_s11 = sshll.u32 %s2333_s28, 4  ;;  %s389_s10 = int_to_ptr.vmem [resolvable:$true] %s388_s10  ;;  %s403_s11 = int_to_ptr.vmem [resolvable:$true] %s402_s11 }
  0xda   : > { %s2093_s25 = scalar_lea.hbm %s2934_s8, 2048 }
  0xdb   : > { %p2094_p1 = scmp.ne.s32.totalorder %s2934_s8, %s2093_s25  ;;  %p2100_p12 = scmp.lt.u32.totalorder %s2093_s25, %s2934_s8 }
  0xdd   : > { %p2096_p3 = pnand %p2094_p1, %p2491_p7 }
  0xdf   : > { %p2097_p11 = pneg %p2096_p3 }
  0xe1   : > { %p2102_p13 = pnand %p2100_p12, %p2097_p11 }
  0xe3   : > { %2105 = shalt.err (!%p2102_p13)
}
  0xe4   : > { %s2106_s12 = scalar_lea.vmem %s389_s10, 2048  ;;  %p2114_p6 = scmp.lt.s32.totalorder %s389_s10, %s389_s10 }
  0xe5   : > { %p2107_p0 = scmp.ne.s32.totalorder %s389_s10, %s2106_s12  ;;  %p2115_p8 = scmp.lt.s32.totalorder %s2106_s12, %s2106_s12 }
  0xe7   : > { %p2109_p2 = pnand %p2107_p0, %p2491_p7  ;;  %p2116_p9 = por %p2115_p8, %p2114_p6 }
  0xe9   : > { %p2110_p4 = pneg %p2109_p2 }
  0xeb   : > { %p2117_p10 = pnand %p2116_p9, %p2110_p4 }
  0xed   : > { %2120 = shalt.err (!%p2117_p10)
}
  0xee   : > { %1756 = dma.hbm_to_vmem [thread:$0]  (!%p2475_p5), %s2934_s8, 2048, %s389_s10, [#allocation17], %s2976_s15, %s2976_s15, %s2327_s20  }
  0xef   : > { %s2121_s13 = scalar_lea.hbm %s2935_s9, 16 }
  0xf0   : > { %p2122_p1 = scmp.ne.s32.totalorder %s2935_s9, %s2121_s13  ;;  %p2128_p12 = scmp.lt.u32.totalorder %s2121_s13, %s2935_s9 }
  0xf2   : > { %p2124_p3 = pnand %p2122_p1, %p2491_p7 }
  0xf4   : > { %p2125_p11 = pneg %p2124_p3 }
  0xf6   : > { %p2130_p13 = pnand %p2128_p12, %p2125_p11 }
  0xf8   : > { %2133 = shalt.err (!%p2130_p13)
}
  0xf9   : > { %s2134_s19 = scalar_lea.vmem %s403_s11, 16  ;;  %s2141_s20 = scalar_lea.vmem %s403_s11, 32 }
  0xfa   : > { %p2135_p0 = scmp.ne.s32.totalorder %s403_s11, %s2134_s19  ;;  %p2142_p6 = scmp.lt.s32.totalorder %s403_s11, %s403_s11 }
  0xfb   : > { %p2143_p8 = scmp.lt.s32.totalorder %s2141_s20, %s2134_s19 }
  0xfc   : > { %p2137_p2 = pnand %p2135_p0, %p2491_p7 }
  0xfd   : > { %p2144_p9 = por %p2143_p8, %p2142_p6 }
  0xfe   : > { %p2138_p4 = pneg %p2137_p2 }
 0x100   : > { %p2145_p10 = pnand %p2144_p9, %p2138_p4 }
 0x102   : > { %2148 = shalt.err (!%p2145_p10)
}
 0x103   : > { %s2977_s0 = sld [smem:[#allocation31_spill]]  ;;  %s2978_s12 = sld [smem:[#allocation30_spill]] }
 0x104   : > { %1759 = dma.hbm_to_vmem [thread:$0]  (!%p2475_p5), %s2935_s9, 16, %s403_s11, [#allocation20]  }
 0x105   : > { %s1296_s1 = sadd.s32 4294967294, %s2321_s23   ;;  %s2979_s29 = sld [smem:[#allocation34_spill]] }
 0x106   : > { %s40_s26 = sadd.s32 1, %s2313_s21  ;;  %s43_s30 = sadd.s32 1, %s2317_s22 }
 0x107   : > { %p41_p7 = scmp.ge.s32.totalorder %s40_s26, 13  ;;  %s2980_s28 = sld [smem:[#allocation29_spill]] }
 0x108   : > { %s52_s13 = sadd.s32 1, %s2301_s18  ;;  %p59_p1 = scmp.ne.s32.totalorder %s2301_s18, %s2297_s17 }
 0x109   : > { %p60_p3 = scmp.eq.s32.totalorder %s2321_s23, 0  ;;  %s3014_s26 = smov (%p41_p7, %s40_s26), 0 }
 0x10a   : > { %s3016_s30 = smov (!%p41_p7, %s43_s30), %s2317_s22  ;;  %s48_s24 = ssub.s32 %s2313_s21, %s3014_s26 }
 0x10b   : > { %p2689_p5 = por %p60_p3, %p59_p1  ;;  %p45_p11 = scmp.ge.s32.totalorder %s3016_s30, 2 }
 0x10c   : > { %p65_p12 = scmp.ne.s32.totalorder %s2297_s17, %s2293_s16  ;;  %s267_s25 = sadd.s32 1, %s2977_s0 }
 0x10d   : > { %p277_p13 = scmp.ne.s32.totalorder %s2977_s0, %s2978_s12  ;;  %s3018_s30 = smov (%p45_p11, %s3016_s30), 0 }
 0x10e   : > { %p2982_p0 = scmp.ne.s32.totalorder %s2979_s29, 0  ;;  %s2984_s27 = sadd.s32 4294967295, %s2321_s23  }
 0x10f   : > { %p278_p4 = scmp.eq.s32.totalorder %s2984_s27, 25  ;;  %s47_s19 = ssub.s32 %s2317_s22, %s3018_s30 }
 0x110   : > { %p2702_p2 = por %p2982_p0, %p65_p12  ;;  %p283_p6 = scmp.ne.s32.totalorder %s2978_s12, %s2980_s28 }
 0x111   : > { %s49_s20 = sor.u32 %s48_s24, %s47_s19  ;;  %p265_p8 = scmp.eq.s32.totalorder %s47_s19, 0 }
 0x112   : > { %p50_p9 = scmp.eq.s32.totalorder %s49_s20, 0  ;;  %p2712_p10 = por %p278_p4, %p277_p13 }
 0x113   : > { %s3020_s0 = smov (!%p265_p8, %s2977_s0), %s267_s25  ;;  %p284_p7 = scmp.eq.s32.totalorder %s1296_s1, 25 }
 0x114   : > { %s2985_s16 = scalar_select %p2712_p10, 1, 0 }
 0x115   : > { %s2720_s15 = scalar_select %p50_p9, %s2301_s18, %s52_s13  }
 0x116   : > { %p1777_p1 = scmp.lt.s32.totalorder %s2321_s23, 26  ;;  %s413_s10 = sand.u32 1, %s2301_s18  }
 0x117   : > { %s1310_s29 = sshll.u32 %s2313_s21, 1  ;;  %p2725_p3 = por %p284_p7, %p283_p6 }
 0x118   : > { %s1308_s12 = sshll.u32 %s413_s10, 6  ;;  %s1691_s28 = smul.u32 104, %s2317_s22 }
 0x119   : > { %s2986_s27 = scalar_select %p2725_p3, 1, 0 }
 0x11a   : > { %p2732_p11 = pnand %p1777_p1, %p2689_p5  ;;  %s424_s25 = sadd.s32 %s1691_s28, %s1310_s29 }
 0x11b   : > { %s417_s13 = scalar_lea.vmem [#allocation4], %s1308_s12  ;;  %s1312_s1 = sshll.u32 %s424_s25, 7 }
 0x11c   : > { %s427_s19 = sshll.u32 %s417_s13, 4  ;;  %s2988_s3 = sld [smem:[#allocation36_spill]]  ;;  %s2736_s19 = int_to_ptr.vmem [resolvable:$true] %s427_s19 }
 0x11d   : > { %s2743_s11 = scalar_lea.sflag [#allocation5], %s413_s10  ;;  %p2151_p12 = pneg %p2732_p11 }
 0x122   : > { %s2741_s4 = scalar_lea.hbm %s2988_s3, %s1312_s1  ;;  %s2154_s2 = scalar_lea.hbm %s2988_s3, 26624 }
 0x123   : > { %s2149_s5 = scalar_lea.hbm %s2741_s4, 1024  ;;  %p2155_p4 = scmp.lt.u32.totalorder %s2741_s4, %s2988_s3 }
 0x124   : > { %p2150_p5 = scmp.ne.s32.totalorder %s2741_s4, %s2149_s5  ;;  %p2156_p6 = scmp.lt.u32.totalorder %s2154_s2, %s2149_s5 }
 0x125   : > { %p2158_p9 = scmp.lt.u32.totalorder %s2149_s5, %s2741_s4 }
 0x126   : > { %p2152_p13 = pnand %p2151_p12, %p2150_p5  ;;  %p2157_p8 = por %p2156_p6, %p2155_p4 }
 0x128   : > { %p2153_p0 = pneg %p2152_p13  ;;  %p2159_p7 = por %p2158_p9, %p2157_p8 }
 0x12a   : > { %p2160_p1 = pnand %p2159_p7, %p2153_p0 }
 0x12c   : > { %2163 = shalt.err (!%p2160_p1)
}
 0x12d   : > { %s2164_s10 = scalar_lea.vmem %s2736_s19, 1024  ;;  %s2334_s13 = smov [#allocation4]  }
 0x12e   : > { %p2165_p5 = scmp.ne.s32.totalorder %s2736_s19, %s2164_s10  ;;  %s2169_s1 = sshll.u32 %s2334_s13, 4  ;;  %s2170_s1 = int_to_ptr.vmem [resolvable:$false] %s2169_s1 }
 0x12f   : > { %s2171_s20 = scalar_lea.vmem %s2170_s1, 2048  ;;  %p2172_p10 = scmp.lt.s32.totalorder %s2736_s19, %s2170_s1 }
 0x130   : > { %p2167_p13 = pnand %p2165_p5, %p2151_p12  ;;  %p2173_p4 = scmp.lt.s32.totalorder %s2171_s20, %s2164_s10 }
 0x132   : > { %p2168_p3 = pneg %p2167_p13  ;;  %p2174_p6 = por %p2173_p4, %p2172_p10 }
 0x134   : > { %p2175_p8 = pnand %p2174_p6, %p2168_p3 }
 0x136   : > { %2178 = shalt.err (!%p2175_p8)
}
 0x137   : > { %s2335_s5 = smov 3328   ;;  %s2336_s29 = smov 256  }
 0x138   : > { %s2337_s12 = smov 16   ;;  %s2989_s2 = sld [smem:[#allocation35_spill]] }
 0x139   : > { %1763 = dma.hbm_to_vmem [thread:$0]  (!%p2732_p11), %s2741_s4, 1024, %s2736_s19, %s2743_s11, %s2335_s5, %s2336_s29, %s2337_s12  }
 0x13e   : > { %p2990_p12 = scmp.ne.s32.totalorder %s2989_s2, 0 }
 0x13f   : > { %s441_s28 = sand.u32 (!%p2990_p12), 1, %s2297_s17  }
 0x140   : > { %439 = sbr.rel (%p2990_p12) target bundleno = 1333 (0x535), region = 60  ;;  %s1314_s25 = sshll.u32 (!%p2990_p12), %s441_s28, 6 }
 0x141   : > { %s442_s10 = scalar_lea.sflag (!%p2990_p12), [#allocation5], %s441_s28  ;;  %s2774_s13 = scalar_lea.vmem (!%p2990_p12), [#allocation4], %s1314_s25 }
 0x147   : > { %2252 = dma.done.wait (%p2702_p2), %s442_s10, 1024  }
 0x148   : > { %2254 = vsyncadd (%p2702_p2), %s442_s10, 4294966272  ;;  %s2991_s1 = sld [smem:[#allocation34_spill]] }
 0x14e   : > { %p2992_p10 = scmp.ne.s32.totalorder %s2991_s1, 0 }
 0x150   : > { %2256 = dma.done.wait (%p2992_p10), [#allocation8], 2448  }
 0x151   : > { %2258 = vsyncadd (%p2992_p10), [#allocation8], 4294964848 }
 0x152   : > { %2260 = dma.done.wait (%p2992_p10), [#allocation11], 4096  }
 0x153   : > { %2262 = vsyncadd (%p2992_p10), [#allocation11], 4294963200 }
 0x154   : > { %2264 = dma.done.wait (%p2992_p10), [#allocation14], 2064  }
 0x155   : > { %2266 = vsyncadd (%p2992_p10), [#allocation14], 4294965232 }
 0x156   : > { %2268 = dma.done.wait (%p2992_p10), [#allocation17], 2064  }
 0x157   : > { %2270 = vsyncadd (%p2992_p10), [#allocation17], 4294965232 }
 0x158   : > { %2272 = dma.done.wait (%p2992_p10), [#allocation20], 16  }
 0x159   : > { %2274 = vsyncadd (%p2992_p10), [#allocation20], 4294967280  ;;  %s2993_s4 = sld [smem:[#allocation30_spill]]  ;;  %s2994_s11 = sld [smem:[#allocation32_spill]] }
 0x15f   : > { %s515_s14 = sand.u32 1, %s2993_s4   ;;  %p1325_p2 = scmp.ne.s32.totalorder %s2994_s11, 0 }
 0x160   : > { %s2803_s24 = sshll.u32 %s515_s14, 2  ;;  %v2338_v0 = vmov (!%p1325_p2), -inf   ;;  %v2339_v1 = vmov (!%p1325_p2), inf  }
 0x161   : > { %s517_s19 = scalar_lea.vmem [#allocation21], %s2803_s24  ;;  %522 = sbr.rel (%p1325_p2) target bundleno = 360 (0x168), region = 104  ;;  %523 = vst [vmem:[#allocation2] sm:$0xf] (!%p1325_p2), %v2338_v0  ;;  %524 = vst [vmem:[#allocation3] sm:$0xf] (!%p1325_p2), %v2339_v1 }
 0x168 PF: > { %v533_v2 = vld [vmem:[#allocation7] sm:$0xff]  ;;  %v534_v3 = vld [vmem:[#allocation7 + $0x8] sm:$0xff]  ;;  %v535_v4 = vld [vmem:[#allocation7 + $0x10] sm:$0xff]  ;;  %v2340_v5 = vmov 0.0|0.0   ;;  %vm552_vm0 = vcmask 154624   ;;  %v2341_v32 = vmov 0.0  }
 0x169   : > { %1548 = vmatprep.subr.bf16.mxu0 %v2340_v5  ;;  %1671 = vmatprep.subr.bf16.mxu1 %v2340_v5  ;;  %v1549_v6 = vpack.c.bf16 %v534_v3, %v533_v2  ;;  %v536_v7 = vld [vmem:[#allocation7 + $0x18] sm:$0xff]  ;;  %v537_v9 = vld [vmem:[#allocation7 + $0x20] sm:$0xff]  ;;  %v538_v10 = vld [vmem:[#allocation7 + $0x28] sm:$0xff]  ;;  %vm565_vm1 = vcmask 1042432   ;;  %vm683_vm2 = vcmask 1041409   ;;  %vm685_vm3 = vcmask 1042434  }
 0x16a   : > { %v1552_v8 = vpack.c.bf16 %v536_v7, %v535_v4  ;;  %v526_v11 = vld [vmem:[%s2774_s13 + $0x8] sm:$0xff]  ;;  %v1555_v13 = vpack.c.bf16 %v538_v10, %v537_v9  ;;  %v539_v14 = vld [vmem:[#allocation7 + $0x30] sm:$0xff]  ;;  %v540_v15 = vld [vmem:[#allocation7 + $0x38] sm:$0xff]  ;;  %vm687_vm4 = vcmask 1043459   ;;  %s2995_s20 = sld [smem:[#allocation32_spill]] }
 0x16b   : > { %1550 = vmatpush1.bf16.msra.mxu0 %v1549_v6  ;;  %1681 = vmatpush1.bf16.msra.mxu1 %v1549_v6  ;;  %v530_v12 = vld [vmem:[%s2774_s13 + $0x28] sm:$0xff]  ;;  %v1558_v16 = vpack.c.bf16 %v540_v15, %v539_v14  ;;  %v541_v17 = vld [vmem:[#allocation7 + $0x40] sm:$0xff]  ;;  %v543_v20 = vld [vmem:[#allocation7 + $0x50] sm:$0xff] }
 0x16c   : > { %1551 = vmatprep.subr.bf16.mxu0 %v2340_v5  ;;  %1672 = vmatprep.subr.bf16.mxu1 %v2340_v5  ;;  %v542_v18 = vld [vmem:[#allocation7 + $0x48] sm:$0xff]  ;;  %v544_v21 = vld [vmem:[#allocation7 + $0x58] sm:$0xff]  ;;  %v545_v23 = vld [vmem:[#allocation7 + $0x60] sm:$0xff] }
 0x16d   : > { %1327 = vmatprep.mubr.msk.f32.mxu0 %vm552_vm0, %v526_v11  ;;  %1329 = vmatprep.mubr.msk.f32.mxu1 %vm552_vm0, %v530_v12  ;;  %v1561_v19 = vpack.c.bf16 %v542_v18, %v541_v17  ;;  %v1564_v22 = vpack.c.bf16 %v544_v21, %v543_v20  ;;  %v546_v24 = vld [vmem:[#allocation7 + $0x68] sm:$0xff]  ;;  %v547_v26 = vld [vmem:[#allocation7 + $0x70] sm:$0xff]  ;;  %v548_v27 = vld [vmem:[#allocation7 + $0x78] sm:$0xff] }
 0x16e   : > { %v1567_v25 = vpack.c.bf16 %v546_v24, %v545_v23  ;;  %v1570_v28 = vpack.c.bf16 %v548_v27, %v547_v26  ;;  %v549_v29 = vld [vmem:[#allocation7 + $0x80] sm:$0xff]  ;;  %v550_v30 = vld [vmem:[#allocation7 + $0x88] sm:$0xff]  ;;  %v551_v33 = vld [vmem:[#allocation7 + $0x90] sm:$0x7] }
 0x16f   : > { %1553 = vmatpush1.bf16.msra.mxu0 %v1552_v8  ;;  %1682 = vmatpush1.bf16.msra.mxu1 %v1552_v8  ;;  %v1573_v31 = vpack.c.bf16 %v550_v30, %v549_v29  ;;  %v525_v34 = vld [vmem:[%s2774_s13] sm:$0xff]  ;;  %v528_v36 = vld [vmem:[%s2774_s13 + $0x18] sm:$0xff]  ;;  %v527_v38 = vld [vmem:[%s2774_s13 + $0x10] sm:$0xff] }
 0x170   : > { %1554 = vmatprep.subr.bf16.mxu0 %v2340_v5  ;;  %1673 = vmatprep.subr.bf16.mxu1 %v2340_v5  ;;  %v529_v35 = vld [vmem:[%s2774_s13 + $0x20] sm:$0xff]  ;;  %v532_v37 = vld [vmem:[%s2774_s13 + $0x38] sm:$0xff]  ;;  %v531_v39 = vld [vmem:[%s2774_s13 + $0x30] sm:$0xff]  ;;  %p1331_p3 = scmp.ne.s32.totalorder %s2995_s20, 12 }
 0x171   : > { %v692_v30 = vld [vmem:[#allocation3] sm:$0xf]  ;;  %vm2343_vm5 = vmmov (!%p1331_p3), 0  }
 0x173   : > { %1556 = vmatpush1.bf16.msra.mxu0 %v1555_v13  ;;  %1683 = vmatpush1.bf16.msra.mxu1 %v1555_v13 }
 0x174   : > { %1557 = vmatprep.subr.bf16.mxu0 %v2340_v5  ;;  %1674 = vmatprep.subr.bf16.mxu1 %v2340_v5 }
 0x177   : > { %1559 = vmatpush1.bf16.msra.mxu0 %v1558_v16  ;;  %1684 = vmatpush1.bf16.msra.mxu1 %v1558_v16 }
 0x178   : > { %1560 = vmatprep.subr.bf16.mxu0 %v2340_v5  ;;  %1675 = vmatprep.subr.bf16.mxu1 %v2340_v5 }
 0x17b   : > { %1562 = vmatpush1.bf16.msra.mxu0 %v1561_v19  ;;  %1685 = vmatpush1.bf16.msra.mxu1 %v1561_v19 }
 0x17c   : > { %1563 = vmatprep.subr.bf16.mxu0 %v2340_v5  ;;  %1676 = vmatprep.subr.bf16.mxu1 %v2340_v5 }
 0x17f   : > { %1565 = vmatpush1.bf16.msra.mxu0 %v1564_v22  ;;  %1686 = vmatpush1.bf16.msra.mxu1 %v1564_v22 }
 0x180   : > { %1566 = vmatprep.subr.bf16.mxu0 %v2340_v5  ;;  %1677 = vmatprep.subr.bf16.mxu1 %v2340_v5 }
 0x183   : > { %1568 = vmatpush1.bf16.msra.mxu0 %v1567_v25  ;;  %1687 = vmatpush1.bf16.msra.mxu1 %v1567_v25 }
 0x184   : > { %1569 = vmatprep.subr.bf16.mxu0 %v2340_v5  ;;  %1678 = vmatprep.subr.bf16.mxu1 %v2340_v5 }
 0x187   : > { %1571 = vmatpush1.bf16.msra.mxu0 %v1570_v28  ;;  %1688 = vmatpush1.bf16.msra.mxu1 %v1570_v28  ;;  %v654_v28 = vld [vmem:[#allocation2] sm:$0xf] }
 0x188   : > { %1572 = vmatprep.subr.bf16.mxu0 %v2340_v5  ;;  %1679 = vmatprep.subr.bf16.mxu1 %v2340_v5 }
 0x18b   : > { %1574 = vmatpush1.bf16.msra.mxu0 %v1573_v31  ;;  %1689 = vmatpush1.bf16.msra.mxu1 %v1573_v31 }
 0x18c   : > { %605 = vmatprep.subr.mxu0 %v2341_v32  ;;  %1680 = vmatprep.subr.mxu1 %v2341_v32 }
 0x18f   : > { %1326 = vmatpush1.msk.msra.mxu0 %vm565_vm1, %v551_v33  ;;  %1690 = vmatpush1.msk.msra.mxu1 %vm565_vm1, %v551_v33 }
 0x190   : > { %634 = vmatmul.mubr.f32.vlgmr.msra.gmra.mrb[0].mxu0 %v525_v34  ;;  %644 = vmatmul.mubr.f32.vlgmr.msra.gmra.mrb[0].mxu1 %v529_v35 }
 0x191   : > { %1328 = vmatprep.mubr.msk.f32.mxu0 %vm552_vm0, %v528_v36  ;;  %1330 = vmatprep.mubr.msk.f32.mxu1 %vm552_vm0, %v532_v37 }
 0x194   : > { %639 = vmatmul.mubr.f32.gmra.mrb[2].mxu0 %v527_v38  ;;  %649 = vmatmul.mubr.f32.gmra.mrb[2].mxu1 %v531_v39  ;;  %v758_v38 = vld [vmem:[#allocation12] sm:$0xff] (!%p1331_p3)  ;;  %v759_v39 = vld [vmem:[#allocation12 + $0x8] sm:$0xff] (!%p1331_p3) }
 0x263   : > { %v635_v40 = vpop.f32.mrb[0].mxu0  ;;  %v645_v41 = vpop.f32.mrb[0].mxu1 }
 0x264   : > { %v655_v42 = vrot.slane %v635_v40, 4  ;;  %v667_v43 = vrot.slane %v645_v41, 4  ;;  %v637_v44 = vpop.f32.mrb[1].mxu0  ;;  %v647_v45 = vpop.f32.mrb[1].mxu1 }
 0x265   : > { %v760_v44 = vld [vmem:[#allocation12 + $0x10] sm:$0xff] (!%p1331_p3)  ;;  %v761_v45 = vld [vmem:[#allocation12 + $0x18] sm:$0xff] (!%p1331_p3) }
 0x266   : > { %v656_v46 = vmax.f32 %v635_v40, %v655_v42  ;;  %v694_v47 = vmin.f32 %v635_v40, %v655_v42  ;;  %v668_v48 = vmax.f32 %v645_v41, %v667_v43  ;;  %v706_v49 = vmin.f32 %v645_v41, %v667_v43  ;;  %v742_v40 = vld [vmem:[#allocation10] sm:$0xff] (!%p1331_p3)  ;;  %v743_v43 = vld [vmem:[#allocation10 + $0x8] sm:$0xff] (!%p1331_p3) }
 0x267   : > { %v640_v50 = vpop.f32.mrb[2].mxu0  ;;  %v650_v51 = vpop.f32.mrb[2].mxu1  ;;  %v2342_v41 = vmov (!%p1331_p3), 0.0|0.0   ;;  %v1576_v42 = vpack.c.bf16 (!%p1331_p3), %v759_v39, %v758_v38  ;;  %v929_v38 = vld [vmem:[#allocation15 + $0x30] sm:$0xff] (!%p1331_p3)  ;;  %v930_v39 = vld [vmem:[#allocation15 + $0x38] sm:$0xff] (!%p1331_p3) }
 0x268   : > { %v657_v52 = vrot.slane %v656_v46, 2  ;;  %v695_v53 = vrot.slane %v694_v47, 2  ;;  %v669_v54 = vrot.slane %v668_v48, 2  ;;  %v707_v55 = vrot.slane %v706_v49, 2  ;;  %v642_v56 = vpop.f32.mrb[3].mxu0  ;;  %v652_v57 = vpop.f32.mrb[3].mxu1  ;;  %1575 = vmatprep.subr.bf16.mxu0 (!%p1331_p3), %v2342_v41  ;;  %1599 = vmatprep.subr.bf16.mxu1 (!%p1331_p3), %v2342_v41 }
 0x269   : > { %v661_v58 = vrot.slane %v640_v50, 4  ;;  %v673_v59 = vrot.slane %v650_v51, 4  ;;  %1577 = vmatpush3.bf16.msra.mxu0 (!%p1331_p3), %v1576_v42  ;;  %v931_v42 = vld [vmem:[#allocation15 + $0x40] sm:$0xff] (!%p1331_p3) }
 0x26a   : > { %v658_v60 = vmax.f32 %v656_v46, %v657_v52  ;;  %v696_v61 = vmin.f32 %v694_v47, %v695_v53  ;;  %v670_v2 = vmax.f32 %v668_v48, %v669_v54  ;;  %v708_v3 = vmin.f32 %v706_v49, %v707_v55  ;;  %v744_v47 = vld [vmem:[#allocation10 + $0x10] sm:$0xff] (!%p1331_p3)  ;;  %v745_v48 = vld [vmem:[#allocation10 + $0x18] sm:$0xff] (!%p1331_p3)  ;;  %1578 = vmatprep.subr.bf16.mxu0 (!%p1331_p3), %v2342_v41  ;;  %v762_v52 = vld [vmem:[#allocation12 + $0x20] sm:$0xff] (!%p1331_p3) }
 0x26b   : > { %v662_v62 = vmax.f32 %v640_v50, %v661_v58  ;;  %v700_v63 = vmin.f32 %v640_v50, %v661_v58  ;;  %v674_v0 = vmax.f32 %v650_v51, %v673_v59  ;;  %v712_v1 = vmin.f32 %v650_v51, %v673_v59  ;;  %v763_v53 = vld [vmem:[#allocation12 + $0x28] sm:$0xff] (!%p1331_p3)  ;;  %v746_v54 = vld [vmem:[#allocation10 + $0x20] sm:$0xff] (!%p1331_p3)  ;;  %v764_v58 = vld [vmem:[#allocation12 + $0x30] sm:$0xff] (!%p1331_p3) }
 0x26c   : > { %v659_v8 = vrot.slane %v658_v60, 1  ;;  %v697_v9 = vrot.slane %v696_v61, 1  ;;  %v671_v14 = vrot.slane %v670_v2, 1  ;;  %v709_v15 = vrot.slane %v708_v3, 1  ;;  %v747_v55 = vld [vmem:[#allocation10 + $0x28] sm:$0xff] (!%p1331_p3)  ;;  %v765_v59 = vld [vmem:[#allocation12 + $0x38] sm:$0xff] (!%p1331_p3) }
 0x26d   : > { %v663_v4 = vrot.slane %v662_v62, 2  ;;  %v701_v5 = vrot.slane %v700_v63, 2  ;;  %v675_v6 = vrot.slane %v674_v0, 2  ;;  %v713_v7 = vrot.slane %v712_v1, 2 }
 0x26e   : > { %v660_v20 = vmax.f32 %v658_v60, %v659_v8  ;;  %v698_v21 = vmin.f32 %v696_v61, %v697_v9  ;;  %v672_v24 = vmax.f32 %v670_v2, %v671_v14  ;;  %v710_v25 = vmin.f32 %v708_v3, %v709_v15  ;;  %v748_v60 = vld [vmem:[#allocation10 + $0x30] sm:$0xff] (!%p1331_p3)  ;;  %v749_v61 = vld [vmem:[#allocation10 + $0x38] sm:$0xff] (!%p1331_p3)  ;;  %v750_v2 = vld [vmem:[#allocation10 + $0x40] sm:$0xff] (!%p1331_p3) }
 0x26f   : > { %v664_v10 = vmax.f32 %v662_v62, %v663_v4  ;;  %v702_v11 = vmin.f32 %v700_v63, %v701_v5  ;;  %v676_v12 = vmax.f32 %v674_v0, %v675_v6  ;;  %v714_v13 = vmin.f32 %v712_v1, %v713_v7  ;;  %v766_v0 = vld [vmem:[#allocation12 + $0x40] sm:$0xff] (!%p1331_p3)  ;;  %v767_v1 = vld [vmem:[#allocation12 + $0x48] sm:$0xff] (!%p1331_p3)  ;;  %v768_v6 = vld [vmem:[#allocation12 + $0x50] sm:$0xff] (!%p1331_p3) }
 0x270   : > { %v1600_v46 = vpack.c.bf16 (!%p1331_p3), %v743_v43, %v742_v40  ;;  %v2344_v49 = vmov (!%p1331_p3), 0.0   ;;  %v1579_v50 = vpack.c.bf16 (!%p1331_p3), %v761_v45, %v760_v44  ;;  %v1603_v51 = vpack.c.bf16 (!%p1331_p3), %v745_v48, %v744_v47  ;;  %v751_v3 = vld [vmem:[#allocation10 + $0x48] sm:$0xff] (!%p1331_p3)  ;;  %v769_v7 = vld [vmem:[#allocation12 + $0x58] sm:$0xff] (!%p1331_p3)  ;;  %v752_v8 = vld [vmem:[#allocation10 + $0x50] sm:$0xff] (!%p1331_p3) }
 0x271   : > { %v665_v16 = vrot.slane %v664_v10, 1  ;;  %v703_v17 = vrot.slane %v702_v11, 1  ;;  %v677_v18 = vrot.slane %v676_v12, 1  ;;  %v715_v19 = vrot.slane %v714_v13, 1  ;;  %1440 = vmatprep.mubr.msk.f32.mxu0 (!%p1331_p3), %vm2343_vm5, %v2344_v49  ;;  %1475 = vmatprep.mubr.msk.f32.mxu1 (!%p1331_p3), %vm2343_vm5, %v2344_v49  ;;  %v753_v9 = vld [vmem:[#allocation10 + $0x58] sm:$0xff] (!%p1331_p3)  ;;  %v754_v14 = vld [vmem:[#allocation10 + $0x60] sm:$0xff] (!%p1331_p3) }
 0x272   : > { %1601 = vmatpush3.bf16.msra.mxu1 (!%p1331_p3), %v1600_v46  ;;  %1580 = vmatpush3.bf16.msra.mxu0 (!%p1331_p3), %v1579_v50  ;;  %v1582_v56 = vpack.c.bf16 (!%p1331_p3), %v763_v53, %v762_v52  ;;  %v1606_v57 = vpack.c.bf16 (!%p1331_p3), %v747_v55, %v746_v54  ;;  %v1585_v62 = vpack.c.bf16 (!%p1331_p3), %v765_v59, %v764_v58  ;;  %v755_v15 = vld [vmem:[#allocation10 + $0x68] sm:$0xff] (!%p1331_p3)  ;;  %v933_v45 = vld [vmem:[#allocation15 + $0x50] sm:$0xff] (!%p1331_p3)  ;;  %v934_v46 = vld [vmem:[#allocation15 + $0x58] sm:$0xff] (!%p1331_p3) }
 0x273   : > { %v666_v22 = vmax.f32 %v664_v10, %v665_v16  ;;  %v704_v23 = vmin.f32 %v702_v11, %v703_v17  ;;  %v678_v29 = vmax.f32 %v676_v12, %v677_v18  ;;  %v716_v31 = vmin.f32 %v714_v13, %v715_v19  ;;  %1602 = vmatprep.subr.bf16.mxu1 (!%p1331_p3), %v2342_v41  ;;  %v770_v12 = vld [vmem:[#allocation12 + $0x60] sm:$0xff] (!%p1331_p3)  ;;  %v771_v13 = vld [vmem:[#allocation12 + $0x68] sm:$0xff] (!%p1331_p3)  ;;  %v772_v18 = vld [vmem:[#allocation12 + $0x70] sm:$0xff] (!%p1331_p3) }
 0x274   : > { %730 = sbr.rel (%p1331_p3) target bundleno = 1306 (0x51a), region = 108  ;;  %1581 = vmatprep.subr.bf16.mxu0 (!%p1331_p3), %v2342_v41  ;;  %v1609_v63 = vpack.c.bf16 (!%p1331_p3), %v749_v61, %v748_v60  ;;  %v1588_v4 = vpack.c.bf16 (!%p1331_p3), %v767_v1, %v766_v0  ;;  %v1612_v5 = vpack.c.bf16 (!%p1331_p3), %v751_v3, %v750_v2  ;;  %v1591_v10 = vpack.c.bf16 (!%p1331_p3), %v769_v7, %v768_v6  ;;  %v773_v19 = vld [vmem:[#allocation12 + $0x78] sm:$0xff] (!%p1331_p3)  ;;  %v932_v43 = vld [vmem:[#allocation15 + $0x48] sm:$0xff] (!%p1331_p3)  ;;  %v935_v48 = vld [vmem:[#allocation15 + $0x60] sm:$0xff] (!%p1331_p3) }
 0x275   : > { %v684_v26 = vsel %vm683_vm2, %v666_v22, %v660_v20  ;;  %v721_v27 = vsel %vm683_vm2, %v704_v23, %v698_v21  ;;  %v1615_v11 = vpack.c.bf16 (!%p1331_p3), %v753_v9, %v752_v8  ;;  %v1594_v16 = vpack.c.bf16 (!%p1331_p3), %v771_v13, %v770_v12  ;;  %v756_v20 = vld [vmem:[#allocation10 + $0x70] sm:$0xff] (!%p1331_p3)  ;;  %v757_v21 = vld [vmem:[#allocation10 + $0x78] sm:$0xff] (!%p1331_p3)  ;;  %v1017_v54 = vld [vmem:[#allocation18] sm:$0xff] (!%p1331_p3) }
 0x276   : > { %v686_v32 = vsel %vm685_vm3, %v672_v24, %v684_v26  ;;  %v722_v33 = vsel %vm685_vm3, %v710_v25, %v721_v27  ;;  %1604 = vmatpush3.bf16.msra.mxu1 (!%p1331_p3), %v1603_v51  ;;  %1583 = vmatpush3.bf16.msra.mxu0 (!%p1331_p3), %v1582_v56  ;;  %v1618_v17 = vpack.c.bf16 (!%p1331_p3), %v755_v15, %v754_v14  ;;  %v1332_v23 = vld [vmem:[#allocation9] ss:$0 sm:$0xff] (!%p1331_p3)  ;;  %v923_v27 = vld [vmem:[#allocation15] sm:$0xff] (!%p1331_p3)  ;;  %v937_v51 = vld [vmem:[#allocation15 + $0x70] sm:$0xff] (!%p1331_p3) }
 0x277   : > { %v688_v34 = vsel %vm687_vm4, %v678_v29, %v686_v32  ;;  %v723_v35 = vsel %vm687_vm4, %v716_v31, %v722_v33  ;;  %1605 = vmatprep.subr.bf16.mxu1 (!%p1331_p3), %v2342_v41  ;;  %1584 = vmatprep.subr.bf16.mxu0 (!%p1331_p3), %v2342_v41  ;;  %v1597_v22 = vpack.c.bf16 (!%p1331_p3), %v773_v19, %v772_v18  ;;  %v925_v32 = vld [vmem:[#allocation15 + $0x10] sm:$0xff] (!%p1331_p3)  ;;  %v926_v33 = vld [vmem:[#allocation15 + $0x18] sm:$0xff] (!%p1331_p3)  ;;  %v1021_v60 = vld [vmem:[#allocation18 + $0x20] sm:$0xff] (!%p1331_p3) }
 0x278   : > { %v690_v36 = vmax.f32 %v654_v28, %v688_v34  ;;  %v725_v37 = vmin.f32 %v692_v30, %v723_v35  ;;  %v1621_v25 = vpack.c.bf16 (!%p1331_p3), %v757_v21, %v756_v20  ;;  %v924_v28 = vld [vmem:[#allocation15 + $0x8] sm:$0xff] (!%p1331_p3)  ;;  %v1627_v34 = vpack.c.bf16 (!%p1331_p3), %v926_v33, %v925_v32  ;;  %v927_v35 = vld [vmem:[#allocation15 + $0x20] sm:$0xff] (!%p1331_p3)  ;;  %v938_v52 = vld [vmem:[#allocation15 + $0x78] sm:$0xff] (!%p1331_p3) }
 0x279   : > { %v1624_v31 = vpack.c.bf16 (!%p1331_p3), %v924_v28, %v923_v27  ;;  %v1633_v40 = vpack.c.bf16 (!%p1331_p3), %v930_v39, %v929_v38  ;;  %v1636_v44 = vpack.c.bf16 (!%p1331_p3), %v932_v43, %v931_v42  ;;  %v1639_v47 = vpack.c.bf16 (!%p1331_p3), %v934_v46, %v933_v45  ;;  %v1018_v55 = vld [vmem:[#allocation18 + $0x8] sm:$0xff] (!%p1331_p3)  ;;  %v1019_v56 = vld [vmem:[#allocation18 + $0x10] sm:$0xff] (!%p1331_p3)  ;;  %v1020_v58 = vld [vmem:[#allocation18 + $0x18] sm:$0xff] (!%p1331_p3) }
 0x27a   : > { %691 = vst [vmem:[#allocation2] sm:$0xf] %v690_v36  ;;  %726 = vst [vmem:[#allocation3] sm:$0xf] %v725_v37  ;;  %1607 = vmatpush3.bf16.msra.mxu1 (!%p1331_p3), %v1606_v57  ;;  %1586 = vmatpush3.bf16.msra.mxu0 (!%p1331_p3), %v1585_v62  ;;  %v928_v36 = vld [vmem:[#allocation15 + $0x28] sm:$0xff] (!%p1331_p3)  ;;  %v1645_v53 = vpack.c.bf16 (!%p1331_p3), %v938_v52, %v937_v51  ;;  %v1648_v57 = vpack.c.bf16 (!%p1331_p3), %v1018_v55, %v1017_v54  ;;  %v1024_v0 = vld [vmem:[#allocation18 + $0x38] sm:$0xff] (!%p1331_p3) }
 0x27b   : > { %1608 = vmatprep.subr.bf16.mxu1 %v2342_v41  ;;  %1587 = vmatprep.subr.bf16.mxu0 %v2342_v41  ;;  %v1630_v37 = vpack.c.bf16 %v928_v36, %v927_v35  ;;  %v1651_v59 = vpack.c.bf16 %v1020_v58, %v1019_v56  ;;  %v1022_v61 = vld [vmem:[#allocation18 + $0x28] sm:$0xff]  ;;  %v1025_v2 = vld [vmem:[#allocation18 + $0x40] sm:$0xff]  ;;  %v1028_v6 = vld [vmem:[#allocation18 + $0x58] sm:$0xff] }
 0x27c   : > { %v1654_v62 = vpack.c.bf16 %v1022_v61, %v1021_v60  ;;  %v1026_v3 = vld [vmem:[#allocation18 + $0x48] sm:$0xff]  ;;  %v1029_v8 = vld [vmem:[#allocation18 + $0x60] sm:$0xff]  ;;  %v1333_v13 = vld [vmem:[#allocation13] ss:$0 sm:$0xff] }
 0x27d   : > { %v1030_v9 = vld [vmem:[#allocation18 + $0x68] sm:$0xff]  ;;  %v1031_v19 = vld [vmem:[#allocation18 + $0x70] sm:$0xff]  ;;  %v1032_v20 = vld [vmem:[#allocation18 + $0x78] sm:$0xff] }
 0x27e   : > { %1610 = vmatpush3.bf16.msra.mxu1 %v1609_v63  ;;  %1589 = vmatpush3.bf16.msra.mxu0 %v1588_v4  ;;  %v1023_v63 = vld [vmem:[#allocation18 + $0x30] sm:$0xff]  ;;  %v1660_v4 = vpack.c.bf16 %v1026_v3, %v1025_v2  ;;  %v1669_v21 = vpack.c.bf16 %v1032_v20, %v1031_v19 }
 0x27f   : > { %1611 = vmatprep.subr.bf16.mxu1 %v2342_v41  ;;  %1590 = vmatprep.subr.bf16.mxu0 %v2342_v41  ;;  %v1657_v1 = vpack.c.bf16 %v1024_v0, %v1023_v63 }
 0x281   : > { %v740_v24 = vld [vmem:[#allocation3] sm:$0xf]  ;;  %v731_v26 = vld [vmem:[#allocation2] sm:$0xf] }
 0x282   : > { %1613 = vmatpush3.bf16.msra.mxu1 %v1612_v5  ;;  %1592 = vmatpush3.bf16.msra.mxu0 %v1591_v10  ;;  %v741_v29 = vadd.f32 %v1332_v23, %v740_v24  ;;  %v739_v30 = vadd.f32 %v1332_v23, %v731_v26  ;;  %v1027_v5 = vld [vmem:[#allocation18 + $0x50] sm:$0xff]  ;;  %v1666_v10 = vpack.c.bf16 %v1030_v9, %v1029_v8 }
 0x283   : > { %1614 = vmatprep.subr.bf16.mxu1 %v2342_v41  ;;  %1593 = vmatprep.subr.bf16.mxu0 %v2342_v41  ;;  %v1663_v7 = vpack.c.bf16 %v1028_v6, %v1027_v5 }
 0x286   : > { %1616 = vmatpush3.bf16.msra.mxu1 %v1615_v11  ;;  %1595 = vmatpush3.bf16.msra.mxu0 %v1594_v16 }
 0x287   : > { %1617 = vmatprep.subr.bf16.mxu1 %v2342_v41  ;;  %1596 = vmatprep.subr.bf16.mxu0 %v2342_v41 }
 0x28a   : > { %1619 = vmatpush3.bf16.msra.mxu1 %v1618_v17  ;;  %1598 = vmatpush3.bf16.msra.mxu0 %v1597_v22  ;;  %v1334_v22 = vld [vmem:[#allocation16] ss:$0 sm:$0xff] }
 0x28b   : > { %1620 = vmatprep.subr.bf16.mxu1 %v2342_v41  ;;  %1623 = vmatprep.subr.bf16.mxu0 %v2342_v41 }
 0x28d   : > { %1441 = vmatmul.mubr.f32.vlgmr.msra.gmra.mrb[0].mxu0 %v741_v29 }
 0x28e   : > { %1622 = vmatpush3.bf16.msra.mxu1 %v1621_v25  ;;  %1625 = vmatpush3.bf16.msra.mxu0 %v1624_v31 }
 0x28f   : > { %1647 = vmatprep.subr.bf16.mxu1 %v2342_v41  ;;  %1626 = vmatprep.subr.bf16.mxu0 %v2342_v41 }
 0x290   : > { %1510 = vmatprep.mubr.msk.f32.mxu0 %vm2343_vm5, %v2344_v49 }
 0x291   : > { %1476 = vmatmul.mubr.f32.vlgmr.msra.gmra.mrb[0].mxu1 %v739_v30 }
 0x292   : > { %1545 = vmatprep.mubr.msk.f32.mxu1 %vm2343_vm5, %v2344_v49  ;;  %1628 = vmatpush3.bf16.msra.mxu0 %v1627_v34  ;;  %v936_v49 = vld [vmem:[#allocation15 + $0x68] sm:$0xff] }
 0x293   : > { %1629 = vmatprep.subr.bf16.mxu0 %v2342_v41  ;;  %v1642_v50 = vpack.c.bf16 %v936_v49, %v935_v48  ;;  %1649 = vmatpush3.bf16.msra.mxu1 %v1648_v57 }
 0x294   : > { %1650 = vmatprep.subr.bf16.mxu1 %v2342_v41 }
 0x296   : > { %1631 = vmatpush3.bf16.msra.mxu0 %v1630_v37 }
 0x297   : > { %1632 = vmatprep.subr.bf16.mxu0 %v2342_v41  ;;  %1652 = vmatpush3.bf16.msra.mxu1 %v1651_v59 }
 0x298   : > { %1653 = vmatprep.subr.bf16.mxu1 %v2342_v41 }
 0x29a   : > { %1634 = vmatpush3.bf16.msra.mxu0 %v1633_v40 }
 0x29b   : > { %1635 = vmatprep.subr.bf16.mxu0 %v2342_v41  ;;  %1655 = vmatpush3.bf16.msra.mxu1 %v1654_v62 }
 0x29c   : > { %1656 = vmatprep.subr.bf16.mxu1 %v2342_v41 }
 0x29e   : > { %1637 = vmatpush3.bf16.msra.mxu0 %v1636_v44 }
 0x29f   : > { %1638 = vmatprep.subr.bf16.mxu0 %v2342_v41  ;;  %1658 = vmatpush3.bf16.msra.mxu1 %v1657_v1 }
 0x2a0   : > { %1659 = vmatprep.subr.bf16.mxu1 %v2342_v41 }
 0x2a2   : > { %1640 = vmatpush3.bf16.msra.mxu0 %v1639_v47 }
 0x2a3   : > { %1641 = vmatprep.subr.bf16.mxu0 %v2342_v41  ;;  %1661 = vmatpush3.bf16.msra.mxu1 %v1660_v4 }
 0x2a4   : > { %1662 = vmatprep.subr.bf16.mxu1 %v2342_v41 }
 0x2a6   : > { %1643 = vmatpush3.bf16.msra.mxu0 %v1642_v50 }
 0x2a7   : > { %1644 = vmatprep.subr.bf16.mxu0 %v2342_v41  ;;  %1664 = vmatpush3.bf16.msra.mxu1 %v1663_v7 }
 0x2a8   : > { %1665 = vmatprep.subr.bf16.mxu1 %v2342_v41 }
 0x2aa   : > { %1646 = vmatpush3.bf16.msra.mxu0 %v1645_v53 }
 0x2ab   : > { %1667 = vmatpush3.bf16.msra.mxu1 %v1666_v10 }
 0x2ac   : > { %1668 = vmatprep.subr.bf16.mxu1 %v2342_v41  ;;  %v1335_v41 = vld [vmem:[#allocation19] ss:$0 sm:$0xff] }
 0x2af   : > { %1670 = vmatpush3.bf16.msra.mxu1 %v1669_v21 }
 0x360   : > { %v840_v11 = vpop.f32.mrb[0].mxu0 }
 0x361   : > { %v1442_v14 = vpop.f32.mrb[1].mxu0 }
 0x364   : > { %v910_v12 = vpop.f32.mrb[0].mxu1 }
 0x365   : > { %v911_v15 = vadd.f32 %v910_v12, %v840_v11  ;;  %v1477_v16 = vpop.f32.mrb[1].mxu1 }
 0x367   : > { %v921_v17 = vadd.f32 %v1333_v13, %v911_v15 }
 0x369   : > { %v922_v18 = vmax.f32 %v921_v17, 0.0 }
 0x36b   : > { %1511 = vmatmul.mubr.f32.vlgmr.msra.gmra.mrb[2].mxu0 %v922_v18 }
 0x43e   : > { %v1012_v23 = vpop.f32.mrb[2].mxu0 }
 0x43f   : > { %v1013_v24 = vadd.f32 %v1334_v22, %v1012_v23  ;;  %v1512_v25 = vpop.f32.mrb[3].mxu0 }
 0x441   : > { %v1016_v26 = vmax.f32 %v1013_v24, 0.0 }
 0x443   : > { %1546 = vmatmul.mubr.f32.vlgmr.msra.gmra.mrb[2].mxu1 %v1016_v26 }
 0x516   : > { %v1106_v27 = vpop.f32.mrb[2].mxu1 }
 0x517   : > { %v1107_v28 = vadd.f32 %v1335_v41, %v1106_v27  ;;  %v1547_v29 = vpop.f32.mrb[3].mxu1 }
 0x519   : > { %1110 = vst [vmem:[%s517_s19] sm:$0xf] %v1107_v28 }
 0x51a PF: > { %s2996_s5 = sld [smem:[#allocation33_spill]]  ;;  %s2998_s25 = sld [smem:[#allocation42_spill]] }
 0x51b   : > { %s1125_s13 = sshll.u32 %s517_s19, 4  ;;  %s1112_s1 = scalar_lea.sflag [#allocation6], %s515_s14  ;;  %s1126_s13 = int_to_ptr.vmem [resolvable:$true] %s1125_s13 }
 0x51c   : > { %s2179_s4 = scalar_lea.vmem %s1126_s13, 64  ;;  %p2999_p0 = scmp.ne.s32.totalorder %s2985_s16, 0 }
 0x51d   : > { %p2180_p11 = scmp.ne.s32.totalorder %s1126_s13, %s2179_s4  ;;  %s2345_s11 = smov [#allocation21]  }
 0x51e   : > { %s2183_s20 = sshll.u32 %s2345_s11, 4  ;;  %s2184_s20 = int_to_ptr.vmem [resolvable:$false] %s2183_s20 }
 0x51f   : > { %p2181_p9 = pnand %p2180_p11, %p2999_p0  ;;  %s2185_s3 = scalar_lea.vmem %s2184_s20, 128 }
 0x520   : > { %s1337_s12 = sshll.u32 %s2996_s5, 6  ;;  %p2186_p1 = scmp.lt.s32.totalorder %s1126_s13, %s2184_s20 }
 0x521   : > { %s2866_s10 = scalar_lea.hbm %s2998_s25, %s1337_s12  ;;  %p2182_p7 = pneg %p2181_p9 }
 0x522   : > { %p2187_p5 = scmp.lt.s32.totalorder %s2185_s3, %s2179_s4 }
 0x524   : > { %p2188_p13 = por %p2187_p5, %p2186_p1 }
 0x526   : > { %p2189_p4 = pnand %p2188_p13, %p2182_p7 }
 0x528   : > { %2192 = shalt.err (!%p2189_p4)
}
 0x529   : > { %s2193_s14 = scalar_lea.hbm %s2866_s10, 64  ;;  %s2197_s5 = scalar_lea.hbm %s2998_s25, 128 }
 0x52a   : > { %p2194_p6 = scmp.ne.s32.totalorder %s2866_s10, %s2193_s14  ;;  %p2198_p10 = scmp.lt.u32.totalorder %s2866_s10, %s2998_s25 }
 0x52b   : > { %p2199_p2 = scmp.lt.u32.totalorder %s2197_s5, %s2193_s14  ;;  %p2201_p11 = scmp.lt.u32.totalorder %s2193_s14, %s2866_s10 }
 0x52c   : > { %p2195_p8 = pnand %p2194_p6, %p2999_p0 }
 0x52d   : > { %p2200_p3 = por %p2199_p2, %p2198_p10 }
 0x52e   : > { %p2196_p12 = pneg %p2195_p8 }
 0x52f   : > { %p2202_p9 = por %p2201_p11, %p2200_p3 }
 0x531   : > { %p2203_p7 = pnand %p2202_p9, %p2196_p12 }
 0x533   : > { %2206 = shalt.err (!%p2203_p7)
}
 0x534   : > { %1730 = dma.vmem_to_hbm [thread:$0]  (%p2999_p0), %s1126_s13, 64, %s2866_s10, %s1112_s1  }
 0x535 PF: > { %s3000_s3 = sld [smem:[#allocation29_spill]]  ;;  %p1787_p1 = scmp.ge.s32.totalorder %s2321_s23, 2 }
 0x536   : > { %p3001_p5 = scmp.ne.s32.totalorder %s2986_s27, 0 }
 0x538   : > { %p1765_p13 = pnand %p1787_p1, %p3001_p5 }
 0x53b   : > { %s1137_s2 = sand.u32 1, %s3000_s3  }
 0x53c   : > { %s1138_s28 = scalar_lea.sflag [#allocation6], %s1137_s2 }
 0x53d   : > { %2276 = dma.done.wait (!%p1765_p13), %s1138_s28, 64  }
 0x53e   : > { %2278 = vsyncadd (!%p1765_p13), %s1138_s28, 4294967232  ;;  %s31_s23 = sadd.s32 1, %s2321_s23   ;;  %s3002_s13 = sld [smem:[#allocation30_spill]] }
 0x53f   : > { %p28_p4 = scmp.ge.s32.totalorder %s31_s23, 28   ;;  %s3003_s14 = sld [smem:[#allocation31_spill]] }
 0x540   : > { %s3004_s10 = smov %s2720_s15  ;;  %s3005_s15 = smov %s3020_s0 }
 0x541   : > { %s3006_s16 = smov %s2297_s17  ;;  %s3007_s17 = smov %s2301_s18 }
 0x542   : > { %s3008_s18 = smov %s3004_s10  ;;  %s3009_s19 = smov %s2313_s21 }
 0x543   : > { %s3010_s20 = smov %s2317_s22  ;;  %s3011_s21 = smov %s3014_s26 }
 0x544   : > { %s3012_s22 = smov %s3018_s30  ;;  %30 = sbr.rel (!%p28_p4) target bundleno = 22 (0x16), region = 149 }
 0x54b   :  { %1143 = vsyncpa [#allocation5], 1 }
 0x54c   :  { %1145 = vsyncpa [#allocation5 + $0x1], 1 }
 0x54d   :  { %1146 = vsyncpa [#allocation8], 1 }
 0x54e   :  { %1147 = vsyncpa [#allocation11], 1 }
 0x54f   :  { %1148 = vsyncpa [#allocation14], 1 }
 0x550   :  { %1149 = vsyncpa [#allocation17], 1 }
 0x551   :  { %1150 = vsyncpa [#allocation20], 1 }
 0x552   :  { %1151 = vsyncpa [#allocation6], 1 }
 0x553   :  { %1153 = vsyncpa [#allocation6 + $0x1], 1 }

</bundles_post_ra>
